<compile_context>
chip_gen: v6e
topology: v6e:2x2x1
jax: 0.10.0
libtpu: 0.0.40
codegen_flags: <defaults>
</compile_context>

<pallas_src>
import math

import jax
import jax.numpy as jnp
from jax import lax
from jax.experimental import pallas as pl
from jax.experimental.pallas import tpu as pltpu


def make_lstm_kernel(L, T, B, H, Hs, gates_dtype):
    """Builds the kernel with static layer/time/batch-tile/hidden sizes.

    Kernel refs (per batch tile of the grid):
      x_ref    : (T*B, Din)        bf16  time-major flattened layer-0 input
      wih0_ref : (Din, 4H)         bf16  layer-0 input->gates weights (transposed)
      wihr_ref : (max(L-1,1), Hs, 4H) bf16 upper layers' input->gates weights
                                        (contraction rows zero-padded H -> Hs)
      whh_ref  : (L, H, 4H)        bf16  hidden->gates weights (transposed)
      b_ref    : (L, 1, 4H)        f32   combined bias (b_ih + b_hh)
      wfc_ref  : (H, Cpad)         bf16  final linear weight (transposed, lane-padded)
      bfc_ref  : (1, Cpad)         f32   final linear bias (lane-padded)
      out_ref  : (B, Cpad)         f32   logits (lane-dense, sublane-full)
      gx_buf   : VMEM (T*B, 4H)    gates_dtype  hoisted input projection + bias
      seq_buf  : VMEM (T*B, Hs)    bf16  current layer's output sequence (next input)
    """
    G = 4 * H
    sliced_eup = (H % 128 == 0)          # only slice transcendentals when lane-aligned
    need_store = (L > 1)

    def kernel(x_ref, wih0_ref, wihr_ref, whh_ref, b_ref, wfc_ref, bfc_ref,
               out_ref, gx_buf, seq_buf):
        # Layer 0: hoisted input projection for all timesteps (one MXU matmul),
        # bias folded in once.
        gx_buf[...] = (jnp.dot(x_ref[...], wih0_ref[...],
                               preferred_element_type=jnp.float32)
                       + b_ref[0]).astype(gates_dtype)

        # Hoisted (loop-invariant) zero pad block for lane-dense seq_buf stores.
        if need_store and Hs > H:
            pad_zeros = jnp.zeros((B, Hs - H), jnp.float32)

        h_final = jnp.zeros((B, H), jnp.float32)

        for l in range(L):                       # static unroll over layers
            whh_l = whh_ref[l]                   # (H, 4H) bf16, static slice
            is_last_layer = (l == L - 1)
            write_out = not is_last_layer

            def time_body(t, carry, whh_l=whh_l, write_out=write_out):
                h, c = carry
                off = pl.multiple_of(t * B, B)
                gx_t = gx_buf[pl.ds(off, B), :].astype(jnp.float32)   # (B, 4H)
                # TODO(synk): hold whh_l resident in the MXU across the time
                # loop via pltpu.matmul_push_rhs / matmul_acc_lhs / matmul_pop
                # (and MRB accumulation of gx_t on v7x) to cut the per-step RHS
                # reload off the latency-bound critical path.
                g = gx_t + jnp.dot(h.astype(jnp.bfloat16), whh_l,
                                   preferred_element_type=jnp.float32)

                if sliced_eup:
                    # Only the needed columns hit the EUP (i,f sigmoid; g tanh; o sigmoid).
                    sig_if = jax.nn.sigmoid(g[:, 0:2 * H])
                    i_g = sig_if[:, 0:H]
                    f_g = sig_if[:, H:2 * H]
                    g_g = jnp.tanh(g[:, 2 * H:3 * H])
                    o_g = jax.nn.sigmoid(g[:, 3 * H:4 * H])
                else:
                    # Small H: full-vreg EUP work, then slice quarters.
                    sig = jax.nn.sigmoid(g)
                    th = jnp.tanh(g)
                    i_g = sig[:, 0 * H:1 * H]
                    f_g = sig[:, 1 * H:2 * H]
                    g_g = th[:, 2 * H:3 * H]
                    o_g = sig[:, 3 * H:4 * H]

                c_new = f_g * c + i_g * g_g
                h_new = o_g * jnp.tanh(c_new)

                if write_out:
                    # This layer's output becomes the next layer's input.
                    if Hs > H:
                        h_st = jnp.concatenate([h_new, pad_zeros], axis=-1)
                    else:
                        h_st = h_new
                    seq_buf[pl.ds(off, B), :] = h_st.astype(jnp.bfloat16)
                return (h_new, c_new)

            h0 = jnp.zeros((B, H), jnp.float32)
            c0 = jnp.zeros((B, H), jnp.float32)
            h_final, _ = lax.fori_loop(0, T, time_body, (h0, c0),
                                       unroll=min(T, 8))

            if not is_last_layer:
                # Hoisted projection of the whole output sequence for layer l+1.
                gx_buf[...] = (jnp.dot(seq_buf[...], wihr_ref[l],
                                       preferred_element_type=jnp.float32)
                               + b_ref[l + 1]).astype(gates_dtype)

        # fc(lstm_out[:, -1, :]) : last timestep hidden state of the last layer.
        out_ref[...] = (jnp.dot(h_final.astype(jnp.bfloat16), wfc_ref[...],
                                preferred_element_type=jnp.float32)
                        + bfc_ref[...])

    return kernel


def lstm_model_forward(x, layer_params, wfc, bfc, hidden_size):
    """Packs PyTorch-layout params and invokes the Pallas kernel.

    x            : (B, T, input_size) float32, batch_first like PyTorch
    layer_params : list of (w_ih (4H, Din), w_hh (4H, H), b_ih (4H,), b_hh (4H,))
    wfc          : (num_classes, H)
    bfc          : (num_classes,)
    """
    B, T, Din = x.shape
    H = hidden_size
    L = len(layer_params)
    C = wfc.shape[0]
    G = 4 * H

    try:
        kind = jax.devices()[0].device_kind.lower()
    except Exception:  # pragma: no cover - defensive, detection only
        kind = ""
    is_v7 = "v7" in kind

    # v7x has 2 TensorCores: split the (independent) batch rows across them.
    # On v5e/v6e a grid is just a serial loop, so keep everything in one tile.
    NB = 2 if (is_v7 and B > 8) else 1
    align = 8 * NB
    B_pad = ((B + align - 1) // align) * align   # sublane-full, divisible by NB
    B_tile = B_pad // NB

    C_pad = ((C + 127) // 128) * 128             # lane-dense output
    Hs = H if H >= 128 else 128                  # lane-dense inter-layer buffer

    # gx_buf is the dominant VMEM consumer; halve it on v7x (64 MiB VMEM).
    gates_dtype = jnp.bfloat16 if is_v7 else jnp.float32

    # (B, T, Din) -> (NB, T*B_tile, Din), time-major inside each batch tile.
    x_tm = jnp.transpose(x, (1, 0, 2)).astype(jnp.float32)        # (T, B, Din)
    if B_pad > B:
        x_tm = jnp.pad(x_tm, ((0, 0), (0, B_pad - B), (0, 0)))
    x_flat = (x_tm.reshape(T, NB, B_tile, Din)
                   .transpose(1, 0, 2, 3)
                   .reshape(NB, T * B_tile, Din)
                   .astype(jnp.bfloat16))

    # Layer-0 input weights kept separate (no zero-padded K rows for upper layers).
    w_ih0 = jnp.transpose(layer_params[0][0]).astype(jnp.bfloat16)       # (Din, 4H)
    if L > 1:
        wihr = jnp.stack([jnp.transpose(p[0]) for p in layer_params[1:]], axis=0)
        if Hs > H:                                                        # zero contraction rows
            wihr = jnp.pad(wihr, ((0, 0), (0, Hs - H), (0, 0)))
        wihr = wihr.astype(jnp.bfloat16)                                  # (L-1, Hs, 4H)
    else:
        wihr = jnp.zeros((1, 8, 128), jnp.bfloat16)                       # dummy, never read

    whh = jnp.stack([jnp.transpose(p[1]) for p in layer_params],
                    axis=0).astype(jnp.bfloat16)                          # (L, H, 4H)
    b = jnp.stack([(p[2] + p[3]).reshape(1, G) for p in layer_params],
                  axis=0).astype(jnp.float32)                             # (L, 1, 4H)

    wfc_p = jnp.pad(jnp.transpose(wfc), ((0, 0), (0, C_pad - C))).astype(jnp.bfloat16)
    bfc_p = jnp.pad(bfc.reshape(1, C), ((0, 0), (0, C_pad - C))).astype(jnp.float32)

    kernel = make_lstm_kernel(L, T, B_tile, H, Hs, gates_dtype)

    inputs = (x_flat, w_ih0, wihr, whh, b, wfc_p, bfc_p)

    def _full_spec(a):
        nd = a.ndim
        return pl.BlockSpec(a.shape, lambda j, _n=nd: (0,) * _n)

    in_specs = ([pl.BlockSpec((None, T * B_tile, Din), lambda j: (j, 0, 0))]
                + [_full_spec(a) for a in inputs[1:]])
    out_specs = pl.BlockSpec((None, B_tile, C_pad), lambda j: (j, 0, 0))

    scratch_shapes = [
        pltpu.VMEM((T * B_tile, G), gates_dtype),    # hoisted gates buffer
        pltpu.VMEM((T * B_tile, Hs), jnp.bfloat16),  # layer output sequence
    ]

    # Explicit VMEM budget: double-buffered in/out blocks + persistent scratch,
    # with headroom, capped below physical VMEM (64 MiB v7x, 128 MiB v5e/v6e).
    blk_bytes = (T * B_tile * Din * 2
                 + sum(int(math.prod(a.shape)) * jnp.dtype(a.dtype).itemsize
                       for a in inputs[1:])
                 + B_tile * C_pad * 4)
    scratch_bytes = (T * B_tile * G * jnp.dtype(gates_dtype).itemsize
                     + T * B_tile * Hs * 2)
    need = 2 * blk_bytes + scratch_bytes + (4 << 20)
    cap = (60 << 20) if is_v7 else (100 << 20)
    vmem_limit = int(min(cap, max(need, 32 << 20)))

    out = pl.pallas_call(
        kernel,
        out_shape=jax.ShapeDtypeStruct((NB, B_tile, C_pad), jnp.float32),
        grid=(NB,),
        in_specs=in_specs,
        out_specs=out_specs,
        scratch_shapes=scratch_shapes,
        compiler_params=pltpu.CompilerParams(
            dimension_semantics=("parallel",),
            vmem_limit_bytes=vmem_limit),
    )(*inputs)

    # TODO(synk): for very long sequences, time-chunk gx_buf/seq_buf (VMEM
    # independent of T) and give x a per-chunk BlockSpec so the HBM->VMEM DMA
    # of x is double-buffered behind the hoisted projection.
    return out.reshape(B_pad, C_pad)[:B, :C]


def ref_forward(x, layer_params, wfc, bfc):
    """Pure-JAX f32 reference mirroring PyTorch nn.LSTM + Linear semantics."""
    B, T, _ = x.shape
    seq = x
    for (w_ih, w_hh, b_ih, b_hh) in layer_params:
        H = w_hh.shape[1]
        h = jnp.zeros((B, H), jnp.float32)
        c = jnp.zeros((B, H), jnp.float32)
        outs = []
        for t in range(T):
            g = seq[:, t] @ w_ih.T + h @ w_hh.T + b_ih + b_hh
            i_g, f_g, g_g, o_g = jnp.split(g, 4, axis=-1)
            i_g = jax.nn.sigmoid(i_g)
            f_g = jax.nn.sigmoid(f_g)
            g_g = jnp.tanh(g_g)
            o_g = jax.nn.sigmoid(o_g)
            c = f_g * c + i_g * g_g
            h = o_g * jnp.tanh(c)
            outs.append(h)
        seq = jnp.stack(outs, axis=1)
    return seq[:, -1] @ wfc.T + bfc


if __name__ == "__main__":
    # Small shapes consistent with the module's forward.
    batch, seq_len = 4, 8
    input_size, hidden_size, num_layers, num_classes = 16, 32, 2, 5

    key = jax.random.PRNGKey(0)
    k_x, key = jax.random.split(key)
    x = jax.random.normal(k_x, (batch, seq_len, input_size), dtype=jnp.float32)

    # Deterministic parameter init mimicking PyTorch uniform(-1/sqrt(H), 1/sqrt(H)).
    bound = 1.0 / (hidden_size ** 0.5)
    layer_params = []
    for layer in range(num_layers):
        din = input_size if layer == 0 else hidden_size
        k1, k2, k3, k4, key = jax.random.split(key, 5)
        w_ih = jax.random.uniform(k1, (4 * hidden_size, din), jnp.float32, -bound, bound)
        w_hh = jax.random.uniform(k2, (4 * hidden_size, hidden_size), jnp.float32, -bound, bound)
        b_ih = jax.random.uniform(k3, (4 * hidden_size,), jnp.float32, -bound, bound)
        b_hh = jax.random.uniform(k4, (4 * hidden_size,), jnp.float32, -bound, bound)
        layer_params.append((w_ih, w_hh, b_ih, b_hh))

    k5, k6, key = jax.random.split(key, 3)
    wfc = jax.random.uniform(k5, (num_classes, hidden_size), jnp.float32, -bound, bound)
    bfc = jax.random.uniform(k6, (num_classes,), jnp.float32, -bound, bound)

    out = lstm_model_forward(x, layer_params, wfc, bfc, hidden_size)
    out = jax.block_until_ready(out)

    ref = ref_forward(x, layer_params, wfc, bfc)
    assert out.shape == (batch, num_classes)
    # bf16 MXU operands (f32 accumulation/state) -> slightly looser tolerance vs f32 ref.
    assert jnp.allclose(out, ref, atol=5e-2, rtol=5e-2), "Pallas output mismatch vs reference"

    print("KERNEL_OK")
</pallas_src>

<mosaic_0001>
module attributes {stable_mosaic.version = 11 : i64} {
  func.func @kernel(%arg0: i32, %arg1: memref<1x64x16xbf16, #tpu.memory_space<vmem>>, %arg2: memref<16x128xbf16, #tpu.memory_space<vmem>>, %arg3: memref<1x128x128xbf16, #tpu.memory_space<vmem>>, %arg4: memref<2x32x128xbf16, #tpu.memory_space<vmem>>, %arg5: memref<2x1x128xf32, #tpu.memory_space<vmem>>, %arg6: memref<32x128xbf16, #tpu.memory_space<vmem>>, %arg7: memref<1x128xf32, #tpu.memory_space<vmem>>, %arg8: memref<1x8x128xf32, #tpu.memory_space<vmem>>, %arg9: memref<64x128xf32, #tpu.memory_space<vmem>>, %arg10: memref<64x128xbf16, #tpu.memory_space<vmem>>) attributes {dimension_semantics = [#tpu.dimension_semantics<parallel>], iteration_bounds = array<i64: 1>, scalar_prefetch = 0 : i64, scratch_operands = 2 : i64, tpu.core_type = #tpu.core_type<tc>, window_params = [{transform_indices = @transform_0, window_bounds = array<i64: 1, 64, 16>}, {pipeline_mode = #tpu.pipeline_mode<synchronous>, transform_indices = @transform_1, window_bounds = array<i64: 16, 128>}, {pipeline_mode = #tpu.pipeline_mode<synchronous>, transform_indices = @transform_2, window_bounds = array<i64: 1, 128, 128>}, {pipeline_mode = #tpu.pipeline_mode<synchronous>, transform_indices = @transform_3, window_bounds = array<i64: 2, 32, 128>}, {pipeline_mode = #tpu.pipeline_mode<synchronous>, transform_indices = @transform_4, window_bounds = array<i64: 2, 1, 128>}, {pipeline_mode = #tpu.pipeline_mode<synchronous>, transform_indices = @transform_5, window_bounds = array<i64: 32, 128>}, {pipeline_mode = #tpu.pipeline_mode<synchronous>, transform_indices = @transform_6, window_bounds = array<i64: 1, 128>}, {transform_indices = @transform_7, window_bounds = array<i64: 1, 8, 128>}]} {
    %c0 = arith.constant 0 : index
    %c0_0 = arith.constant 0 : index
    %c0_1 = arith.constant 0 : index
    %0 = vector.load %arg1[%c0, %c0_0, %c0_1] : memref<1x64x16xbf16, #tpu.memory_space<vmem>>, vector<1x64x16xbf16>
    %1 = vector.shape_cast %0 : vector<1x64x16xbf16> to vector<64x16xbf16>
    %c0_2 = arith.constant 0 : index
    %c0_3 = arith.constant 0 : index
    %2 = vector.load %arg2[%c0_2, %c0_3] : memref<16x128xbf16, #tpu.memory_space<vmem>>, vector<16x128xbf16>
    %cst = arith.constant dense<0.000000e+00> : vector<64x128xf32>
    %3 = tpu.matmul %1, %2, %cst {dimension_numbers = #tpu.dot_dimension_numbers<[1], [0], [0], [1], [0, 0, 1, 1], [], []>} : vector<64x16xbf16>, vector<16x128xbf16>, vector<64x128xf32> -> vector<64x128xf32>
    %c0_4 = arith.constant 0 : index
    %c0_5 = arith.constant 0 : index
    %c0_6 = arith.constant 0 : index
    %4 = vector.load %arg5[%c0_4, %c0_5, %c0_6] : memref<2x1x128xf32, #tpu.memory_space<vmem>>, vector<1x1x128xf32>
    %5 = vector.shape_cast %4 : vector<1x1x128xf32> to vector<1x128xf32>
    %6 = vector.broadcast %5 : vector<1x128xf32> to vector<64x128xf32>
    %7 = arith.addf %3, %6 : vector<64x128xf32>
    %c0_7 = arith.constant 0 : index
    %c0_8 = arith.constant 0 : index
    %8 = vector.load %arg9[%c0_7, %c0_8] : memref<64x128xf32, #tpu.memory_space<vmem>>, vector<64x128xf32>
    tpu.vector_store %arg9[%c0_7, %c0_8], %7 {strides = array<i32>} : memref<64x128xf32, #tpu.memory_space<vmem>>, vector<64x128xf32>,
    %cst_9 = arith.constant 0.000000e+00 : f32
    %9 = vector.broadcast %cst_9 : f32 to vector<8x96xf32>
    %c0_10 = arith.constant 0 : index
    %c0_11 = arith.constant 0 : index
    %c0_12 = arith.constant 0 : index
    %10 = vector.load %arg4[%c0_10, %c0_11, %c0_12] : memref<2x32x128xbf16, #tpu.memory_space<vmem>>, vector<1x32x128xbf16>
    %11 = vector.shape_cast %10 : vector<1x32x128xbf16> to vector<32x128xbf16>
    %cst_13 = arith.constant 0.000000e+00 : f32
    %12 = vector.broadcast %cst_13 : f32 to vector<8x32xf32>
    %cst_14 = arith.constant 0.000000e+00 : f32
    %13 = vector.broadcast %cst_14 : f32 to vector<8x32xf32>
    %c0_i32 = arith.constant 0 : i32
    %c8_i32 = arith.constant 8 : i32
    %14 = arith.muli %c0_i32, %c8_i32 : i32
    %15 = tpu.assume_multiple %14, 8 : i32
    %16 = arith.index_cast %15 : i32 to index
    %c0_15 = arith.constant 0 : index
    %17 = vector.load %arg9[%16, %c0_15] : memref<64x128xf32, #tpu.memory_space<vmem>>, vector<8x128xf32>
    %18 = arith.truncf %12 : vector<8x32xf32> to vector<8x32xbf16>
    %cst_16 = arith.constant dense<0.000000e+00> : vector<8x128xf32>
    %19 = tpu.matmul %18, %11, %cst_16 {dimension_numbers = #tpu.dot_dimension_numbers<[1], [0], [0], [1], [0, 0, 1, 1], [], []>} : vector<8x32xbf16>, vector<32x128xbf16>, vector<8x128xf32> -> vector<8x128xf32>
    %20 = arith.addf %17, %19 : vector<8x128xf32>
    %21 = arith.negf %20 : vector<8x128xf32>
    %22 = math.exp %21 : vector<8x128xf32>
    %cst_17 = arith.constant 1.000000e+00 : f32
    %23 = vector.broadcast %cst_17 : f32 to vector<8x128xf32>
    %24 = arith.addf %23, %22 : vector<8x128xf32>
    %25 = arith.divf %23, %24 : vector<8x128xf32>
    %26 = math.tanh %20 : vector<8x128xf32>
    %27 = vector.extract_strided_slice %25 {offsets = [0, 0], sizes = [8, 32], strides = [1, 1]} : vector<8x128xf32> to vector<8x32xf32>
    %28 = vector.extract_strided_slice %25 {offsets = [0, 32], sizes = [8, 32], strides = [1, 1]} : vector<8x128xf32> to vector<8x32xf32>
    %29 = vector.extract_strided_slice %26 {offsets = [0, 64], sizes = [8, 32], strides = [1, 1]} : vector<8x128xf32> to vector<8x32xf32>
    %30 = vector.extract_strided_slice %25 {offsets = [0, 96], sizes = [8, 32], strides = [1, 1]} : vector<8x128xf32> to vector<8x32xf32>
    %31 = arith.mulf %28, %13 : vector<8x32xf32>
    %32 = arith.mulf %27, %29 : vector<8x32xf32>
    %33 = arith.addf %31, %32 : vector<8x32xf32>
    %34 = math.tanh %33 : vector<8x32xf32>
    %35 = arith.mulf %30, %34 : vector<8x32xf32>
    %36 = tpu.concatenate %35, %9 in 1 : vector<8x32xf32>, vector<8x96xf32> -> vector<8x128xf32>
    %37 = arith.truncf %36 : vector<8x128xf32> to vector<8x128xbf16>
    %38 = arith.index_cast %15 : i32 to index
    %c0_18 = arith.constant 0 : index
    %39 = vector.load %arg10[%38, %c0_18] : memref<64x128xbf16, #tpu.memory_space<vmem>>, vector<8x128xbf16>
    tpu.vector_store %arg10[%38, %c0_18], %37 {strides = array<i32>} : memref<64x128xbf16, #tpu.memory_space<vmem>>, vector<8x128xbf16>,
    %c1_i32 = arith.constant 1 : i32
    %c8_i32_19 = arith.constant 8 : i32
    %40 = arith.muli %c1_i32, %c8_i32_19 : i32
    %41 = tpu.assume_multiple %40, 8 : i32
    %42 = arith.index_cast %41 : i32 to index
    %c0_20 = arith.constant 0 : index
    %43 = vector.load %arg9[%42, %c0_20] : memref<64x128xf32, #tpu.memory_space<vmem>>, vector<8x128xf32>
    %44 = arith.truncf %35 : vector<8x32xf32> to vector<8x32xbf16>
    %cst_21 = arith.constant dense<0.000000e+00> : vector<8x128xf32>
    %45 = tpu.matmul %44, %11, %cst_21 {dimension_numbers = #tpu.dot_dimension_numbers<[1], [0], [0], [1], [0, 0, 1, 1], [], []>} : vector<8x32xbf16>, vector<32x128xbf16>, vector<8x128xf32> -> vector<8x128xf32>
    %46 = arith.addf %43, %45 : vector<8x128xf32>
    %47 = arith.negf %46 : vector<8x128xf32>
    %48 = math.exp %47 : vector<8x128xf32>
    %cst_22 = arith.constant 1.000000e+00 : f32
    %49 = vector.broadcast %cst_22 : f32 to vector<8x128xf32>
    %50 = arith.addf %49, %48 : vector<8x128xf32>
    %51 = arith.divf %49, %50 : vector<8x128xf32>
    %52 = math.tanh %46 : vector<8x128xf32>
    %53 = vector.extract_strided_slice %51 {offsets = [0, 0], sizes = [8, 32], strides = [1, 1]} : vector<8x128xf32> to vector<8x32xf32>
    %54 = vector.extract_strided_slice %51 {offsets = [0, 32], sizes = [8, 32], strides = [1, 1]} : vector<8x128xf32> to vector<8x32xf32>
    %55 = vector.extract_strided_slice %52 {offsets = [0, 64], sizes = [8, 32], strides = [1, 1]} : vector<8x128xf32> to vector<8x32xf32>
    %56 = vector.extract_strided_slice %51 {offsets = [0, 96], sizes = [8, 32], strides = [1, 1]} : vector<8x128xf32> to vector<8x32xf32>
    %57 = arith.mulf %54, %33 : vector<8x32xf32>
    %58 = arith.mulf %53, %55 : vector<8x32xf32>
    %59 = arith.addf %57, %58 : vector<8x32xf32>
    %60 = math.tanh %59 : vector<8x32xf32>
    %61 = arith.mulf %56, %60 : vector<8x32xf32>
    %62 = tpu.concatenate %61, %9 in 1 : vector<8x32xf32>, vector<8x96xf32> -> vector<8x128xf32>
    %63 = arith.truncf %62 : vector<8x128xf32> to vector<8x128xbf16>
    %64 = arith.index_cast %41 : i32 to index
    %c0_23 = arith.constant 0 : index
    %65 = vector.load %arg10[%64, %c0_23] : memref<64x128xbf16, #tpu.memory_space<vmem>>, vector<8x128xbf16>
    tpu.vector_store %arg10[%64, %c0_23], %63 {strides = array<i32>} : memref<64x128xbf16, #tpu.memory_space<vmem>>, vector<8x128xbf16>,
    %c2_i32 = arith.constant 2 : i32
    %c8_i32_24 = arith.constant 8 : i32
    %66 = arith.muli %c2_i32, %c8_i32_24 : i32
    %67 = tpu.assume_multiple %66, 8 : i32
    %68 = arith.index_cast %67 : i32 to index
    %c0_25 = arith.constant 0 : index
    %69 = vector.load %arg9[%68, %c0_25] : memref<64x128xf32, #tpu.memory_space<vmem>>, vector<8x128xf32>
    %70 = arith.truncf %61 : vector<8x32xf32> to vector<8x32xbf16>
    %cst_26 = arith.constant dense<0.000000e+00> : vector<8x128xf32>
    %71 = tpu.matmul %70, %11, %cst_26 {dimension_numbers = #tpu.dot_dimension_numbers<[1], [0], [0], [1], [0, 0, 1, 1], [], []>} : vector<8x32xbf16>, vector<32x128xbf16>, vector<8x128xf32> -> vector<8x128xf32>
    %72 = arith.addf %69, %71 : vector<8x128xf32>
    %73 = arith.negf %72 : vector<8x128xf32>
    %74 = math.exp %73 : vector<8x128xf32>
    %cst_27 = arith.constant 1.000000e+00 : f32
    %75 = vector.broadcast %cst_27 : f32 to vector<8x128xf32>
    %76 = arith.addf %75, %74 : vector<8x128xf32>
    %77 = arith.divf %75, %76 : vector<8x128xf32>
    %78 = math.tanh %72 : vector<8x128xf32>
    %79 = vector.extract_strided_slice %77 {offsets = [0, 0], sizes = [8, 32], strides = [1, 1]} : vector<8x128xf32> to vector<8x32xf32>
    %80 = vector.extract_strided_slice %77 {offsets = [0, 32], sizes = [8, 32], strides = [1, 1]} : vector<8x128xf32> to vector<8x32xf32>
    %81 = vector.extract_strided_slice %78 {offsets = [0, 64], sizes = [8, 32], strides = [1, 1]} : vector<8x128xf32> to vector<8x32xf32>
    %82 = vector.extract_strided_slice %77 {offsets = [0, 96], sizes = [8, 32], strides = [1, 1]} : vector<8x128xf32> to vector<8x32xf32>
    %83 = arith.mulf %80, %59 : vector<8x32xf32>
    %84 = arith.mulf %79, %81 : vector<8x32xf32>
    %85 = arith.addf %83, %84 : vector<8x32xf32>
    %86 = math.tanh %85 : vector<8x32xf32>
    %87 = arith.mulf %82, %86 : vector<8x32xf32>
    %88 = tpu.concatenate %87, %9 in 1 : vector<8x32xf32>, vector<8x96xf32> -> vector<8x128xf32>
    %89 = arith.truncf %88 : vector<8x128xf32> to vector<8x128xbf16>
    %90 = arith.index_cast %67 : i32 to index
    %c0_28 = arith.constant 0 : index
    %91 = vector.load %arg10[%90, %c0_28] : memref<64x128xbf16, #tpu.memory_space<vmem>>, vector<8x128xbf16>
    tpu.vector_store %arg10[%90, %c0_28], %89 {strides = array<i32>} : memref<64x128xbf16, #tpu.memory_space<vmem>>, vector<8x128xbf16>,
    %c3_i32 = arith.constant 3 : i32
    %c8_i32_29 = arith.constant 8 : i32
    %92 = arith.muli %c3_i32, %c8_i32_29 : i32
    %93 = tpu.assume_multiple %92, 8 : i32
    %94 = arith.index_cast %93 : i32 to index
    %c0_30 = arith.constant 0 : index
    %95 = vector.load %arg9[%94, %c0_30] : memref<64x128xf32, #tpu.memory_space<vmem>>, vector<8x128xf32>
    %96 = arith.truncf %87 : vector<8x32xf32> to vector<8x32xbf16>
    %cst_31 = arith.constant dense<0.000000e+00> : vector<8x128xf32>
    %97 = tpu.matmul %96, %11, %cst_31 {dimension_numbers = #tpu.dot_dimension_numbers<[1], [0], [0], [1], [0, 0, 1, 1], [], []>} : vector<8x32xbf16>, vector<32x128xbf16>, vector<8x128xf32> -> vector<8x128xf32>
    %98 = arith.addf %95, %97 : vector<8x128xf32>
    %99 = arith.negf %98 : vector<8x128xf32>
    %100 = math.exp %99 : vector<8x128xf32>
    %cst_32 = arith.constant 1.000000e+00 : f32
    %101 = vector.broadcast %cst_32 : f32 to vector<8x128xf32>
    %102 = arith.addf %101, %100 : vector<8x128xf32>
    %103 = arith.divf %101, %102 : vector<8x128xf32>
    %104 = math.tanh %98 : vector<8x128xf32>
    %105 = vector.extract_strided_slice %103 {offsets = [0, 0], sizes = [8, 32], strides = [1, 1]} : vector<8x128xf32> to vector<8x32xf32>
    %106 = vector.extract_strided_slice %103 {offsets = [0, 32], sizes = [8, 32], strides = [1, 1]} : vector<8x128xf32> to vector<8x32xf32>
    %107 = vector.extract_strided_slice %104 {offsets = [0, 64], sizes = [8, 32], strides = [1, 1]} : vector<8x128xf32> to vector<8x32xf32>
    %108 = vector.extract_strided_slice %103 {offsets = [0, 96], sizes = [8, 32], strides = [1, 1]} : vector<8x128xf32> to vector<8x32xf32>
    %109 = arith.mulf %106, %85 : vector<8x32xf32>
    %110 = arith.mulf %105, %107 : vector<8x32xf32>
    %111 = arith.addf %109, %110 : vector<8x32xf32>
    %112 = math.tanh %111 : vector<8x32xf32>
    %113 = arith.mulf %108, %112 : vector<8x32xf32>
    %114 = tpu.concatenate %113, %9 in 1 : vector<8x32xf32>, vector<8x96xf32> -> vector<8x128xf32>
    %115 = arith.truncf %114 : vector<8x128xf32> to vector<8x128xbf16>
    %116 = arith.index_cast %93 : i32 to index
    %c0_33 = arith.constant 0 : index
    %117 = vector.load %arg10[%116, %c0_33] : memref<64x128xbf16, #tpu.memory_space<vmem>>, vector<8x128xbf16>
    tpu.vector_store %arg10[%116, %c0_33], %115 {strides = array<i32>} : memref<64x128xbf16, #tpu.memory_space<vmem>>, vector<8x128xbf16>,
    %c4_i32 = arith.constant 4 : i32
    %c8_i32_34 = arith.constant 8 : i32
    %118 = arith.muli %c4_i32, %c8_i32_34 : i32
    %119 = tpu.assume_multiple %118, 8 : i32
    %120 = arith.index_cast %119 : i32 to index
    %c0_35 = arith.constant 0 : index
    %121 = vector.load %arg9[%120, %c0_35] : memref<64x128xf32, #tpu.memory_space<vmem>>, vector<8x128xf32>
    %122 = arith.truncf %113 : vector<8x32xf32> to vector<8x32xbf16>
    %cst_36 = arith.constant dense<0.000000e+00> : vector<8x128xf32>
    %123 = tpu.matmul %122, %11, %cst_36 {dimension_numbers = #tpu.dot_dimension_numbers<[1], [0], [0], [1], [0, 0, 1, 1], [], []>} : vector<8x32xbf16>, vector<32x128xbf16>, vector<8x128xf32> -> vector<8x128xf32>
    %124 = arith.addf %121, %123 : vector<8x128xf32>
    %125 = arith.negf %124 : vector<8x128xf32>
    %126 = math.exp %125 : vector<8x128xf32>
    %cst_37 = arith.constant 1.000000e+00 : f32
    %127 = vector.broadcast %cst_37 : f32 to vector<8x128xf32>
    %128 = arith.addf %127, %126 : vector<8x128xf32>
    %129 = arith.divf %127, %128 : vector<8x128xf32>
    %130 = math.tanh %124 : vector<8x128xf32>
    %131 = vector.extract_strided_slice %129 {offsets = [0, 0], sizes = [8, 32], strides = [1, 1]} : vector<8x128xf32> to vector<8x32xf32>
    %132 = vector.extract_strided_slice %129 {offsets = [0, 32], sizes = [8, 32], strides = [1, 1]} : vector<8x128xf32> to vector<8x32xf32>
    %133 = vector.extract_strided_slice %130 {offsets = [0, 64], sizes = [8, 32], strides = [1, 1]} : vector<8x128xf32> to vector<8x32xf32>
    %134 = vector.extract_strided_slice %129 {offsets = [0, 96], sizes = [8, 32], strides = [1, 1]} : vector<8x128xf32> to vector<8x32xf32>
    %135 = arith.mulf %132, %111 : vector<8x32xf32>
    %136 = arith.mulf %131, %133 : vector<8x32xf32>
    %137 = arith.addf %135, %136 : vector<8x32xf32>
    %138 = math.tanh %137 : vector<8x32xf32>
    %139 = arith.mulf %134, %138 : vector<8x32xf32>
    %140 = tpu.concatenate %139, %9 in 1 : vector<8x32xf32>, vector<8x96xf32> -> vector<8x128xf32>
    %141 = arith.truncf %140 : vector<8x128xf32> to vector<8x128xbf16>
    %142 = arith.index_cast %119 : i32 to index
    %c0_38 = arith.constant 0 : index
    %143 = vector.load %arg10[%142, %c0_38] : memref<64x128xbf16, #tpu.memory_space<vmem>>, vector<8x128xbf16>
    tpu.vector_store %arg10[%142, %c0_38], %141 {strides = array<i32>} : memref<64x128xbf16, #tpu.memory_space<vmem>>, vector<8x128xbf16>,
    %c5_i32 = arith.constant 5 : i32
    %c8_i32_39 = arith.constant 8 : i32
    %144 = arith.muli %c5_i32, %c8_i32_39 : i32
    %145 = tpu.assume_multiple %144, 8 : i32
    %146 = arith.index_cast %145 : i32 to index
    %c0_40 = arith.constant 0 : index
    %147 = vector.load %arg9[%146, %c0_40] : memref<64x128xf32, #tpu.memory_space<vmem>>, vector<8x128xf32>
    %148 = arith.truncf %139 : vector<8x32xf32> to vector<8x32xbf16>
    %cst_41 = arith.constant dense<0.000000e+00> : vector<8x128xf32>
    %149 = tpu.matmul %148, %11, %cst_41 {dimension_numbers = #tpu.dot_dimension_numbers<[1], [0], [0], [1], [0, 0, 1, 1], [], []>} : vector<8x32xbf16>, vector<32x128xbf16>, vector<8x128xf32> -> vector<8x128xf32>
    %150 = arith.addf %147, %149 : vector<8x128xf32>
    %151 = arith.negf %150 : vector<8x128xf32>
    %152 = math.exp %151 : vector<8x128xf32>
    %cst_42 = arith.constant 1.000000e+00 : f32
    %153 = vector.broadcast %cst_42 : f32 to vector<8x128xf32>
    %154 = arith.addf %153, %152 : vector<8x128xf32>
    %155 = arith.divf %153, %154 : vector<8x128xf32>
    %156 = math.tanh %150 : vector<8x128xf32>
    %157 = vector.extract_strided_slice %155 {offsets = [0, 0], sizes = [8, 32], strides = [1, 1]} : vector<8x128xf32> to vector<8x32xf32>
    %158 = vector.extract_strided_slice %155 {offsets = [0, 32], sizes = [8, 32], strides = [1, 1]} : vector<8x128xf32> to vector<8x32xf32>
    %159 = vector.extract_strided_slice %156 {offsets = [0, 64], sizes = [8, 32], strides = [1, 1]} : vector<8x128xf32> to vector<8x32xf32>
    %160 = vector.extract_strided_slice %155 {offsets = [0, 96], sizes = [8, 32], strides = [1, 1]} : vector<8x128xf32> to vector<8x32xf32>
    %161 = arith.mulf %158, %137 : vector<8x32xf32>
    %162 = arith.mulf %157, %159 : vector<8x32xf32>
    %163 = arith.addf %161, %162 : vector<8x32xf32>
    %164 = math.tanh %163 : vector<8x32xf32>
    %165 = arith.mulf %160, %164 : vector<8x32xf32>
    %166 = tpu.concatenate %165, %9 in 1 : vector<8x32xf32>, vector<8x96xf32> -> vector<8x128xf32>
    %167 = arith.truncf %166 : vector<8x128xf32> to vector<8x128xbf16>
    %168 = arith.index_cast %145 : i32 to index
    %c0_43 = arith.constant 0 : index
    %169 = vector.load %arg10[%168, %c0_43] : memref<64x128xbf16, #tpu.memory_space<vmem>>, vector<8x128xbf16>
    tpu.vector_store %arg10[%168, %c0_43], %167 {strides = array<i32>} : memref<64x128xbf16, #tpu.memory_space<vmem>>, vector<8x128xbf16>,
    %c6_i32 = arith.constant 6 : i32
    %c8_i32_44 = arith.constant 8 : i32
    %170 = arith.muli %c6_i32, %c8_i32_44 : i32
    %171 = tpu.assume_multiple %170, 8 : i32
    %172 = arith.index_cast %171 : i32 to index
    %c0_45 = arith.constant 0 : index
    %173 = vector.load %arg9[%172, %c0_45] : memref<64x128xf32, #tpu.memory_space<vmem>>, vector<8x128xf32>
    %174 = arith.truncf %165 : vector<8x32xf32> to vector<8x32xbf16>
    %cst_46 = arith.constant dense<0.000000e+00> : vector<8x128xf32>
    %175 = tpu.matmul %174, %11, %cst_46 {dimension_numbers = #tpu.dot_dimension_numbers<[1], [0], [0], [1], [0, 0, 1, 1], [], []>} : vector<8x32xbf16>, vector<32x128xbf16>, vector<8x128xf32> -> vector<8x128xf32>
    %176 = arith.addf %173, %175 : vector<8x128xf32>
    %177 = arith.negf %176 : vector<8x128xf32>
    %178 = math.exp %177 : vector<8x128xf32>
    %cst_47 = arith.constant 1.000000e+00 : f32
    %179 = vector.broadcast %cst_47 : f32 to vector<8x128xf32>
    %180 = arith.addf %179, %178 : vector<8x128xf32>
    %181 = arith.divf %179, %180 : vector<8x128xf32>
    %182 = math.tanh %176 : vector<8x128xf32>
    %183 = vector.extract_strided_slice %181 {offsets = [0, 0], sizes = [8, 32], strides = [1, 1]} : vector<8x128xf32> to vector<8x32xf32>
    %184 = vector.extract_strided_slice %181 {offsets = [0, 32], sizes = [8, 32], strides = [1, 1]} : vector<8x128xf32> to vector<8x32xf32>
    %185 = vector.extract_strided_slice %182 {offsets = [0, 64], sizes = [8, 32], strides = [1, 1]} : vector<8x128xf32> to vector<8x32xf32>
    %186 = vector.extract_strided_slice %181 {offsets = [0, 96], sizes = [8, 32], strides = [1, 1]} : vector<8x128xf32> to vector<8x32xf32>
    %187 = arith.mulf %184, %163 : vector<8x32xf32>
    %188 = arith.mulf %183, %185 : vector<8x32xf32>
    %189 = arith.addf %187, %188 : vector<8x32xf32>
    %190 = math.tanh %189 : vector<8x32xf32>
    %191 = arith.mulf %186, %190 : vector<8x32xf32>
    %192 = tpu.concatenate %191, %9 in 1 : vector<8x32xf32>, vector<8x96xf32> -> vector<8x128xf32>
    %193 = arith.truncf %192 : vector<8x128xf32> to vector<8x128xbf16>
    %194 = arith.index_cast %171 : i32 to index
    %c0_48 = arith.constant 0 : index
    %195 = vector.load %arg10[%194, %c0_48] : memref<64x128xbf16, #tpu.memory_space<vmem>>, vector<8x128xbf16>
    tpu.vector_store %arg10[%194, %c0_48], %193 {strides = array<i32>} : memref<64x128xbf16, #tpu.memory_space<vmem>>, vector<8x128xbf16>,
    %c7_i32 = arith.constant 7 : i32
    %c8_i32_49 = arith.constant 8 : i32
    %196 = arith.muli %c7_i32, %c8_i32_49 : i32
    %197 = tpu.assume_multiple %196, 8 : i32
    %198 = arith.index_cast %197 : i32 to index
    %c0_50 = arith.constant 0 : index
    %199 = vector.load %arg9[%198, %c0_50] : memref<64x128xf32, #tpu.memory_space<vmem>>, vector<8x128xf32>
    %200 = arith.truncf %191 : vector<8x32xf32> to vector<8x32xbf16>
    %cst_51 = arith.constant dense<0.000000e+00> : vector<8x128xf32>
    %201 = tpu.matmul %200, %11, %cst_51 {dimension_numbers = #tpu.dot_dimension_numbers<[1], [0], [0], [1], [0, 0, 1, 1], [], []>} : vector<8x32xbf16>, vector<32x128xbf16>, vector<8x128xf32> -> vector<8x128xf32>
    %202 = arith.addf %199, %201 : vector<8x128xf32>
    %203 = arith.negf %202 : vector<8x128xf32>
    %204 = math.exp %203 : vector<8x128xf32>
    %cst_52 = arith.constant 1.000000e+00 : f32
    %205 = vector.broadcast %cst_52 : f32 to vector<8x128xf32>
    %206 = arith.addf %205, %204 : vector<8x128xf32>
    %207 = arith.divf %205, %206 : vector<8x128xf32>
    %208 = math.tanh %202 : vector<8x128xf32>
    %209 = vector.extract_strided_slice %207 {offsets = [0, 0], sizes = [8, 32], strides = [1, 1]} : vector<8x128xf32> to vector<8x32xf32>
    %210 = vector.extract_strided_slice %207 {offsets = [0, 32], sizes = [8, 32], strides = [1, 1]} : vector<8x128xf32> to vector<8x32xf32>
    %211 = vector.extract_strided_slice %208 {offsets = [0, 64], sizes = [8, 32], strides = [1, 1]} : vector<8x128xf32> to vector<8x32xf32>
    %212 = vector.extract_strided_slice %207 {offsets = [0, 96], sizes = [8, 32], strides = [1, 1]} : vector<8x128xf32> to vector<8x32xf32>
    %213 = arith.mulf %210, %189 : vector<8x32xf32>
    %214 = arith.mulf %209, %211 : vector<8x32xf32>
    %215 = arith.addf %213, %214 : vector<8x32xf32>
    %216 = math.tanh %215 : vector<8x32xf32>
    %217 = arith.mulf %212, %216 : vector<8x32xf32>
    %218 = tpu.concatenate %217, %9 in 1 : vector<8x32xf32>, vector<8x96xf32> -> vector<8x128xf32>
    %219 = arith.truncf %218 : vector<8x128xf32> to vector<8x128xbf16>
    %220 = arith.index_cast %197 : i32 to index
    %c0_53 = arith.constant 0 : index
    %221 = vector.load %arg10[%220, %c0_53] : memref<64x128xbf16, #tpu.memory_space<vmem>>, vector<8x128xbf16>
    tpu.vector_store %arg10[%220, %c0_53], %219 {strides = array<i32>} : memref<64x128xbf16, #tpu.memory_space<vmem>>, vector<8x128xbf16>,
    %c8_i32_54 = arith.constant 8 : i32
    %c0_55 = arith.constant 0 : index
    %c0_56 = arith.constant 0 : index
    %222 = vector.load %arg10[%c0_55, %c0_56] : memref<64x128xbf16, #tpu.memory_space<vmem>>, vector<64x128xbf16>
    %c0_57 = arith.constant 0 : index
    %c0_58 = arith.constant 0 : index
    %c0_59 = arith.constant 0 : index
    %223 = vector.load %arg3[%c0_57, %c0_58, %c0_59] : memref<1x128x128xbf16, #tpu.memory_space<vmem>>, vector<1x128x128xbf16>
    %224 = vector.shape_cast %223 : vector<1x128x128xbf16> to vector<128x128xbf16>
    %cst_60 = arith.constant dense<0.000000e+00> : vector<64x128xf32>
    %225 = tpu.matmul %222, %224, %cst_60 {dimension_numbers = #tpu.dot_dimension_numbers<[1], [0], [0], [1], [0, 0, 1, 1], [], []>} : vector<64x128xbf16>, vector<128x128xbf16>, vector<64x128xf32> -> vector<64x128xf32>
    %c1 = arith.constant 1 : index
    %c0_61 = arith.constant 0 : index
    %c0_62 = arith.constant 0 : index
    %226 = vector.load %arg5[%c1, %c0_61, %c0_62] : memref<2x1x128xf32, #tpu.memory_space<vmem>>, vector<1x1x128xf32>
    %227 = vector.shape_cast %226 : vector<1x1x128xf32> to vector<1x128xf32>
    %228 = vector.broadcast %227 : vector<1x128xf32> to vector<64x128xf32>
    %229 = arith.addf %225, %228 : vector<64x128xf32>
    %c0_63 = arith.constant 0 : index
    %c0_64 = arith.constant 0 : index
    %230 = vector.load %arg9[%c0_63, %c0_64] : memref<64x128xf32, #tpu.memory_space<vmem>>, vector<64x128xf32>
    tpu.vector_store %arg9[%c0_63, %c0_64], %229 {strides = array<i32>} : memref<64x128xf32, #tpu.memory_space<vmem>>, vector<64x128xf32>,
    %c1_65 = arith.constant 1 : index
    %c0_66 = arith.constant 0 : index
    %c0_67 = arith.constant 0 : index
    %231 = vector.load %arg4[%c1_65, %c0_66, %c0_67] : memref<2x32x128xbf16, #tpu.memory_space<vmem>>, vector<1x32x128xbf16>
    %232 = vector.shape_cast %231 : vector<1x32x128xbf16> to vector<32x128xbf16>
    %cst_68 = arith.constant 0.000000e+00 : f32
    %233 = vector.broadcast %cst_68 : f32 to vector<8x32xf32>
    %cst_69 = arith.constant 0.000000e+00 : f32
    %234 = vector.broadcast %cst_69 : f32 to vector<8x32xf32>
    %c0_i32_70 = arith.constant 0 : i32
    %c8_i32_71 = arith.constant 8 : i32
    %235 = arith.muli %c0_i32_70, %c8_i32_71 : i32
    %236 = tpu.assume_multiple %235, 8 : i32
    %237 = arith.index_cast %236 : i32 to index
    %c0_72 = arith.constant 0 : index
    %238 = vector.load %arg9[%237, %c0_72] : memref<64x128xf32, #tpu.memory_space<vmem>>, vector<8x128xf32>
    %239 = arith.truncf %233 : vector<8x32xf32> to vector<8x32xbf16>
    %cst_73 = arith.constant dense<0.000000e+00> : vector<8x128xf32>
    %240 = tpu.matmul %239, %232, %cst_73 {dimension_numbers = #tpu.dot_dimension_numbers<[1], [0], [0], [1], [0, 0, 1, 1], [], []>} : vector<8x32xbf16>, vector<32x128xbf16>, vector<8x128xf32> -> vector<8x128xf32>
    %241 = arith.addf %238, %240 : vector<8x128xf32>
    %242 = arith.negf %241 : vector<8x128xf32>
    %243 = math.exp %242 : vector<8x128xf32>
    %cst_74 = arith.constant 1.000000e+00 : f32
    %244 = vector.broadcast %cst_74 : f32 to vector<8x128xf32>
    %245 = arith.addf %244, %243 : vector<8x128xf32>
    %246 = arith.divf %244, %245 : vector<8x128xf32>
    %247 = math.tanh %241 : vector<8x128xf32>
    %248 = vector.extract_strided_slice %246 {offsets = [0, 0], sizes = [8, 32], strides = [1, 1]} : vector<8x128xf32> to vector<8x32xf32>
    %249 = vector.extract_strided_slice %246 {offsets = [0, 32], sizes = [8, 32], strides = [1, 1]} : vector<8x128xf32> to vector<8x32xf32>
    %250 = vector.extract_strided_slice %247 {offsets = [0, 64], sizes = [8, 32], strides = [1, 1]} : vector<8x128xf32> to vector<8x32xf32>
    %251 = vector.extract_strided_slice %246 {offsets = [0, 96], sizes = [8, 32], strides = [1, 1]} : vector<8x128xf32> to vector<8x32xf32>
    %252 = arith.mulf %249, %234 : vector<8x32xf32>
    %253 = arith.mulf %248, %250 : vector<8x32xf32>
    %254 = arith.addf %252, %253 : vector<8x32xf32>
    %255 = math.tanh %254 : vector<8x32xf32>
    %256 = arith.mulf %251, %255 : vector<8x32xf32>
    %c1_i32_75 = arith.constant 1 : i32
    %c8_i32_76 = arith.constant 8 : i32
    %257 = arith.muli %c1_i32_75, %c8_i32_76 : i32
    %258 = tpu.assume_multiple %257, 8 : i32
    %259 = arith.index_cast %258 : i32 to index
    %c0_77 = arith.constant 0 : index
    %260 = vector.load %arg9[%259, %c0_77] : memref<64x128xf32, #tpu.memory_space<vmem>>, vector<8x128xf32>
    %261 = arith.truncf %256 : vector<8x32xf32> to vector<8x32xbf16>
    %cst_78 = arith.constant dense<0.000000e+00> : vector<8x128xf32>
    %262 = tpu.matmul %261, %232, %cst_78 {dimension_numbers = #tpu.dot_dimension_numbers<[1], [0], [0], [1], [0, 0, 1, 1], [], []>} : vector<8x32xbf16>, vector<32x128xbf16>, vector<8x128xf32> -> vector<8x128xf32>
    %263 = arith.addf %260, %262 : vector<8x128xf32>
    %264 = arith.negf %263 : vector<8x128xf32>
    %265 = math.exp %264 : vector<8x128xf32>
    %cst_79 = arith.constant 1.000000e+00 : f32
    %266 = vector.broadcast %cst_79 : f32 to vector<8x128xf32>
    %267 = arith.addf %266, %265 : vector<8x128xf32>
    %268 = arith.divf %266, %267 : vector<8x128xf32>
    %269 = math.tanh %263 : vector<8x128xf32>
    %270 = vector.extract_strided_slice %268 {offsets = [0, 0], sizes = [8, 32], strides = [1, 1]} : vector<8x128xf32> to vector<8x32xf32>
    %271 = vector.extract_strided_slice %268 {offsets = [0, 32], sizes = [8, 32], strides = [1, 1]} : vector<8x128xf32> to vector<8x32xf32>
    %272 = vector.extract_strided_slice %269 {offsets = [0, 64], sizes = [8, 32], strides = [1, 1]} : vector<8x128xf32> to vector<8x32xf32>
    %273 = vector.extract_strided_slice %268 {offsets = [0, 96], sizes = [8, 32], strides = [1, 1]} : vector<8x128xf32> to vector<8x32xf32>
    %274 = arith.mulf %271, %254 : vector<8x32xf32>
    %275 = arith.mulf %270, %272 : vector<8x32xf32>
    %276 = arith.addf %274, %275 : vector<8x32xf32>
    %277 = math.tanh %276 : vector<8x32xf32>
    %278 = arith.mulf %273, %277 : vector<8x32xf32>
    %c2_i32_80 = arith.constant 2 : i32
    %c8_i32_81 = arith.constant 8 : i32
    %279 = arith.muli %c2_i32_80, %c8_i32_81 : i32
    %280 = tpu.assume_multiple %279, 8 : i32
    %281 = arith.index_cast %280 : i32 to index
    %c0_82 = arith.constant 0 : index
    %282 = vector.load %arg9[%281, %c0_82] : memref<64x128xf32, #tpu.memory_space<vmem>>, vector<8x128xf32>
    %283 = arith.truncf %278 : vector<8x32xf32> to vector<8x32xbf16>
    %cst_83 = arith.constant dense<0.000000e+00> : vector<8x128xf32>
    %284 = tpu.matmul %283, %232, %cst_83 {dimension_numbers = #tpu.dot_dimension_numbers<[1], [0], [0], [1], [0, 0, 1, 1], [], []>} : vector<8x32xbf16>, vector<32x128xbf16>, vector<8x128xf32> -> vector<8x128xf32>
    %285 = arith.addf %282, %284 : vector<8x128xf32>
    %286 = arith.negf %285 : vector<8x128xf32>
    %287 = math.exp %286 : vector<8x128xf32>
    %cst_84 = arith.constant 1.000000e+00 : f32
    %288 = vector.broadcast %cst_84 : f32 to vector<8x128xf32>
    %289 = arith.addf %288, %287 : vector<8x128xf32>
    %290 = arith.divf %288, %289 : vector<8x128xf32>
    %291 = math.tanh %285 : vector<8x128xf32>
    %292 = vector.extract_strided_slice %290 {offsets = [0, 0], sizes = [8, 32], strides = [1, 1]} : vector<8x128xf32> to vector<8x32xf32>
    %293 = vector.extract_strided_slice %290 {offsets = [0, 32], sizes = [8, 32], strides = [1, 1]} : vector<8x128xf32> to vector<8x32xf32>
    %294 = vector.extract_strided_slice %291 {offsets = [0, 64], sizes = [8, 32], strides = [1, 1]} : vector<8x128xf32> to vector<8x32xf32>
    %295 = vector.extract_strided_slice %290 {offsets = [0, 96], sizes = [8, 32], strides = [1, 1]} : vector<8x128xf32> to vector<8x32xf32>
    %296 = arith.mulf %293, %276 : vector<8x32xf32>
    %297 = arith.mulf %292, %294 : vector<8x32xf32>
    %298 = arith.addf %296, %297 : vector<8x32xf32>
    %299 = math.tanh %298 : vector<8x32xf32>
    %300 = arith.mulf %295, %299 : vector<8x32xf32>
    %c3_i32_85 = arith.constant 3 : i32
    %c8_i32_86 = arith.constant 8 : i32
    %301 = arith.muli %c3_i32_85, %c8_i32_86 : i32
    %302 = tpu.assume_multiple %301, 8 : i32
    %303 = arith.index_cast %302 : i32 to index
    %c0_87 = arith.constant 0 : index
    %304 = vector.load %arg9[%303, %c0_87] : memref<64x128xf32, #tpu.memory_space<vmem>>, vector<8x128xf32>
    %305 = arith.truncf %300 : vector<8x32xf32> to vector<8x32xbf16>
    %cst_88 = arith.constant dense<0.000000e+00> : vector<8x128xf32>
    %306 = tpu.matmul %305, %232, %cst_88 {dimension_numbers = #tpu.dot_dimension_numbers<[1], [0], [0], [1], [0, 0, 1, 1], [], []>} : vector<8x32xbf16>, vector<32x128xbf16>, vector<8x128xf32> -> vector<8x128xf32>
    %307 = arith.addf %304, %306 : vector<8x128xf32>
    %308 = arith.negf %307 : vector<8x128xf32>
    %309 = math.exp %308 : vector<8x128xf32>
    %cst_89 = arith.constant 1.000000e+00 : f32
    %310 = vector.broadcast %cst_89 : f32 to vector<8x128xf32>
    %311 = arith.addf %310, %309 : vector<8x128xf32>
    %312 = arith.divf %310, %311 : vector<8x128xf32>
    %313 = math.tanh %307 : vector<8x128xf32>
    %314 = vector.extract_strided_slice %312 {offsets = [0, 0], sizes = [8, 32], strides = [1, 1]} : vector<8x128xf32> to vector<8x32xf32>
    %315 = vector.extract_strided_slice %312 {offsets = [0, 32], sizes = [8, 32], strides = [1, 1]} : vector<8x128xf32> to vector<8x32xf32>
    %316 = vector.extract_strided_slice %313 {offsets = [0, 64], sizes = [8, 32], strides = [1, 1]} : vector<8x128xf32> to vector<8x32xf32>
    %317 = vector.extract_strided_slice %312 {offsets = [0, 96], sizes = [8, 32], strides = [1, 1]} : vector<8x128xf32> to vector<8x32xf32>
    %318 = arith.mulf %315, %298 : vector<8x32xf32>
    %319 = arith.mulf %314, %316 : vector<8x32xf32>
    %320 = arith.addf %318, %319 : vector<8x32xf32>
    %321 = math.tanh %320 : vector<8x32xf32>
    %322 = arith.mulf %317, %321 : vector<8x32xf32>
    %c4_i32_90 = arith.constant 4 : i32
    %c8_i32_91 = arith.constant 8 : i32
    %323 = arith.muli %c4_i32_90, %c8_i32_91 : i32
    %324 = tpu.assume_multiple %323, 8 : i32
    %325 = arith.index_cast %324 : i32 to index
    %c0_92 = arith.constant 0 : index
    %326 = vector.load %arg9[%325, %c0_92] : memref<64x128xf32, #tpu.memory_space<vmem>>, vector<8x128xf32>
    %327 = arith.truncf %322 : vector<8x32xf32> to vector<8x32xbf16>
    %cst_93 = arith.constant dense<0.000000e+00> : vector<8x128xf32>
    %328 = tpu.matmul %327, %232, %cst_93 {dimension_numbers = #tpu.dot_dimension_numbers<[1], [0], [0], [1], [0, 0, 1, 1], [], []>} : vector<8x32xbf16>, vector<32x128xbf16>, vector<8x128xf32> -> vector<8x128xf32>
    %329 = arith.addf %326, %328 : vector<8x128xf32>
    %330 = arith.negf %329 : vector<8x128xf32>
    %331 = math.exp %330 : vector<8x128xf32>
    %cst_94 = arith.constant 1.000000e+00 : f32
    %332 = vector.broadcast %cst_94 : f32 to vector<8x128xf32>
    %333 = arith.addf %332, %331 : vector<8x128xf32>
    %334 = arith.divf %332, %333 : vector<8x128xf32>
    %335 = math.tanh %329 : vector<8x128xf32>
    %336 = vector.extract_strided_slice %334 {offsets = [0, 0], sizes = [8, 32], strides = [1, 1]} : vector<8x128xf32> to vector<8x32xf32>
    %337 = vector.extract_strided_slice %334 {offsets = [0, 32], sizes = [8, 32], strides = [1, 1]} : vector<8x128xf32> to vector<8x32xf32>
    %338 = vector.extract_strided_slice %335 {offsets = [0, 64], sizes = [8, 32], strides = [1, 1]} : vector<8x128xf32> to vector<8x32xf32>
    %339 = vector.extract_strided_slice %334 {offsets = [0, 96], sizes = [8, 32], strides = [1, 1]} : vector<8x128xf32> to vector<8x32xf32>
    %340 = arith.mulf %337, %320 : vector<8x32xf32>
    %341 = arith.mulf %336, %338 : vector<8x32xf32>
    %342 = arith.addf %340, %341 : vector<8x32xf32>
    %343 = math.tanh %342 : vector<8x32xf32>
    %344 = arith.mulf %339, %343 : vector<8x32xf32>
    %c5_i32_95 = arith.constant 5 : i32
    %c8_i32_96 = arith.constant 8 : i32
    %345 = arith.muli %c5_i32_95, %c8_i32_96 : i32
    %346 = tpu.assume_multiple %345, 8 : i32
    %347 = arith.index_cast %346 : i32 to index
    %c0_97 = arith.constant 0 : index
    %348 = vector.load %arg9[%347, %c0_97] : memref<64x128xf32, #tpu.memory_space<vmem>>, vector<8x128xf32>
    %349 = arith.truncf %344 : vector<8x32xf32> to vector<8x32xbf16>
    %cst_98 = arith.constant dense<0.000000e+00> : vector<8x128xf32>
    %350 = tpu.matmul %349, %232, %cst_98 {dimension_numbers = #tpu.dot_dimension_numbers<[1], [0], [0], [1], [0, 0, 1, 1], [], []>} : vector<8x32xbf16>, vector<32x128xbf16>, vector<8x128xf32> -> vector<8x128xf32>
    %351 = arith.addf %348, %350 : vector<8x128xf32>
    %352 = arith.negf %351 : vector<8x128xf32>
    %353 = math.exp %352 : vector<8x128xf32>
    %cst_99 = arith.constant 1.000000e+00 : f32
    %354 = vector.broadcast %cst_99 : f32 to vector<8x128xf32>
    %355 = arith.addf %354, %353 : vector<8x128xf32>
    %356 = arith.divf %354, %355 : vector<8x128xf32>
    %357 = math.tanh %351 : vector<8x128xf32>
    %358 = vector.extract_strided_slice %356 {offsets = [0, 0], sizes = [8, 32], strides = [1, 1]} : vector<8x128xf32> to vector<8x32xf32>
    %359 = vector.extract_strided_slice %356 {offsets = [0, 32], sizes = [8, 32], strides = [1, 1]} : vector<8x128xf32> to vector<8x32xf32>
    %360 = vector.extract_strided_slice %357 {offsets = [0, 64], sizes = [8, 32], strides = [1, 1]} : vector<8x128xf32> to vector<8x32xf32>
    %361 = vector.extract_strided_slice %356 {offsets = [0, 96], sizes = [8, 32], strides = [1, 1]} : vector<8x128xf32> to vector<8x32xf32>
    %362 = arith.mulf %359, %342 : vector<8x32xf32>
    %363 = arith.mulf %358, %360 : vector<8x32xf32>
    %364 = arith.addf %362, %363 : vector<8x32xf32>
    %365 = math.tanh %364 : vector<8x32xf32>
    %366 = arith.mulf %361, %365 : vector<8x32xf32>
    %c6_i32_100 = arith.constant 6 : i32
    %c8_i32_101 = arith.constant 8 : i32
    %367 = arith.muli %c6_i32_100, %c8_i32_101 : i32
    %368 = tpu.assume_multiple %367, 8 : i32
    %369 = arith.index_cast %368 : i32 to index
    %c0_102 = arith.constant 0 : index
    %370 = vector.load %arg9[%369, %c0_102] : memref<64x128xf32, #tpu.memory_space<vmem>>, vector<8x128xf32>
    %371 = arith.truncf %366 : vector<8x32xf32> to vector<8x32xbf16>
    %cst_103 = arith.constant dense<0.000000e+00> : vector<8x128xf32>
    %372 = tpu.matmul %371, %232, %cst_103 {dimension_numbers = #tpu.dot_dimension_numbers<[1], [0], [0], [1], [0, 0, 1, 1], [], []>} : vector<8x32xbf16>, vector<32x128xbf16>, vector<8x128xf32> -> vector<8x128xf32>
    %373 = arith.addf %370, %372 : vector<8x128xf32>
    %374 = arith.negf %373 : vector<8x128xf32>
    %375 = math.exp %374 : vector<8x128xf32>
    %cst_104 = arith.constant 1.000000e+00 : f32
    %376 = vector.broadcast %cst_104 : f32 to vector<8x128xf32>
    %377 = arith.addf %376, %375 : vector<8x128xf32>
    %378 = arith.divf %376, %377 : vector<8x128xf32>
    %379 = math.tanh %373 : vector<8x128xf32>
    %380 = vector.extract_strided_slice %378 {offsets = [0, 0], sizes = [8, 32], strides = [1, 1]} : vector<8x128xf32> to vector<8x32xf32>
    %381 = vector.extract_strided_slice %378 {offsets = [0, 32], sizes = [8, 32], strides = [1, 1]} : vector<8x128xf32> to vector<8x32xf32>
    %382 = vector.extract_strided_slice %379 {offsets = [0, 64], sizes = [8, 32], strides = [1, 1]} : vector<8x128xf32> to vector<8x32xf32>
    %383 = vector.extract_strided_slice %378 {offsets = [0, 96], sizes = [8, 32], strides = [1, 1]} : vector<8x128xf32> to vector<8x32xf32>
    %384 = arith.mulf %381, %364 : vector<8x32xf32>
    %385 = arith.mulf %380, %382 : vector<8x32xf32>
    %386 = arith.addf %384, %385 : vector<8x32xf32>
    %387 = math.tanh %386 : vector<8x32xf32>
    %388 = arith.mulf %383, %387 : vector<8x32xf32>
    %c7_i32_105 = arith.constant 7 : i32
    %c8_i32_106 = arith.constant 8 : i32
    %389 = arith.muli %c7_i32_105, %c8_i32_106 : i32
    %390 = tpu.assume_multiple %389, 8 : i32
    %391 = arith.index_cast %390 : i32 to index
    %c0_107 = arith.constant 0 : index
    %392 = vector.load %arg9[%391, %c0_107] : memref<64x128xf32, #tpu.memory_space<vmem>>, vector<8x128xf32>
    %393 = arith.truncf %388 : vector<8x32xf32> to vector<8x32xbf16>
    %cst_108 = arith.constant dense<0.000000e+00> : vector<8x128xf32>
    %394 = tpu.matmul %393, %232, %cst_108 {dimension_numbers = #tpu.dot_dimension_numbers<[1], [0], [0], [1], [0, 0, 1, 1], [], []>} : vector<8x32xbf16>, vector<32x128xbf16>, vector<8x128xf32> -> vector<8x128xf32>
    %395 = arith.addf %392, %394 : vector<8x128xf32>
    %396 = arith.negf %395 : vector<8x128xf32>
    %397 = math.exp %396 : vector<8x128xf32>
    %cst_109 = arith.constant 1.000000e+00 : f32
    %398 = vector.broadcast %cst_109 : f32 to vector<8x128xf32>
    %399 = arith.addf %398, %397 : vector<8x128xf32>
    %400 = arith.divf %398, %399 : vector<8x128xf32>
    %401 = math.tanh %395 : vector<8x128xf32>
    %402 = vector.extract_strided_slice %400 {offsets = [0, 0], sizes = [8, 32], strides = [1, 1]} : vector<8x128xf32> to vector<8x32xf32>
    %403 = vector.extract_strided_slice %400 {offsets = [0, 32], sizes = [8, 32], strides = [1, 1]} : vector<8x128xf32> to vector<8x32xf32>
    %404 = vector.extract_strided_slice %401 {offsets = [0, 64], sizes = [8, 32], strides = [1, 1]} : vector<8x128xf32> to vector<8x32xf32>
    %405 = vector.extract_strided_slice %400 {offsets = [0, 96], sizes = [8, 32], strides = [1, 1]} : vector<8x128xf32> to vector<8x32xf32>
    %406 = arith.mulf %403, %386 : vector<8x32xf32>
    %407 = arith.mulf %402, %404 : vector<8x32xf32>
    %408 = arith.addf %406, %407 : vector<8x32xf32>
    %409 = math.tanh %408 : vector<8x32xf32>
    %410 = arith.mulf %405, %409 : vector<8x32xf32>
    %c8_i32_110 = arith.constant 8 : i32
    %411 = arith.truncf %410 : vector<8x32xf32> to vector<8x32xbf16>
    %c0_111 = arith.constant 0 : index
    %c0_112 = arith.constant 0 : index
    %412 = vector.load %arg6[%c0_111, %c0_112] : memref<32x128xbf16, #tpu.memory_space<vmem>>, vector<32x128xbf16>
    %cst_113 = arith.constant dense<0.000000e+00> : vector<8x128xf32>
    %413 = tpu.matmul %411, %412, %cst_113 {dimension_numbers = #tpu.dot_dimension_numbers<[1], [0], [0], [1], [0, 0, 1, 1], [], []>} : vector<8x32xbf16>, vector<32x128xbf16>, vector<8x128xf32> -> vector<8x128xf32>
    %c0_114 = arith.constant 0 : index
    %c0_115 = arith.constant 0 : index
    %414 = vector.load %arg7[%c0_114, %c0_115] : memref<1x128xf32, #tpu.memory_space<vmem>>, vector<1x128xf32>
    %415 = vector.broadcast %414 : vector<1x128xf32> to vector<8x128xf32>
    %416 = arith.addf %413, %415 : vector<8x128xf32>
    %c0_116 = arith.constant 0 : index
    %c0_117 = arith.constant 0 : index
    %c0_118 = arith.constant 0 : index
    %417 = vector.load %arg8[%c0_116, %c0_117, %c0_118] : memref<1x8x128xf32, #tpu.memory_space<vmem>>, vector<1x8x128xf32>
    %418 = vector.shape_cast %417 : vector<1x8x128xf32> to vector<8x128xf32>
    %419 = vector.shape_cast %416 : vector<8x128xf32> to vector<1x8x128xf32>
    tpu.vector_store %arg8[%c0_116, %c0_117, %c0_118], %419 {strides = array<i32>} : memref<1x8x128xf32, #tpu.memory_space<vmem>>, vector<1x8x128xf32>,
    return
  }
  func.func @transform_0(%arg0: i32) -> (i32, i32, i32) {
    %c0_i32 = arith.constant 0 : i32
    %c0_i32_0 = arith.constant 0 : i32
    %c0_i32_1 = arith.constant 0 : i32
    return %arg0, %c0_i32, %c0_i32_0 : i32, i32, i32
  }
  func.func @transform_1(%arg0: i32) -> (i32, i32) {
    %c0_i32 = arith.constant 0 : i32
    %c0_i32_0 = arith.constant 0 : i32
    %c0_i32_1 = arith.constant 0 : i32
    return %c0_i32, %c0_i32_0 : i32, i32
  }
  func.func @transform_2(%arg0: i32) -> (i32, i32, i32) {
    %c0_i32 = arith.constant 0 : i32
    %c0_i32_0 = arith.constant 0 : i32
    %c0_i32_1 = arith.constant 0 : i32
    %c0_i32_2 = arith.constant 0 : i32
    return %c0_i32, %c0_i32_0, %c0_i32_1 : i32, i32, i32
  }
  func.func @transform_3(%arg0: i32) -> (i32, i32, i32) {
    %c0_i32 = arith.constant 0 : i32
    %c0_i32_0 = arith.constant 0 : i32
    %c0_i32_1 = arith.constant 0 : i32
    %c0_i32_2 = arith.constant 0 : i32
    return %c0_i32, %c0_i32_0, %c0_i32_1 : i32, i32, i32
  }
  func.func @transform_4(%arg0: i32) -> (i32, i32, i32) {
    %c0_i32 = arith.constant 0 : i32
    %c0_i32_0 = arith.constant 0 : i32
    %c0_i32_1 = arith.constant 0 : i32
    %c0_i32_2 = arith.constant 0 : i32
    return %c0_i32, %c0_i32_0, %c0_i32_1 : i32, i32, i32
  }
  func.func @transform_5(%arg0: i32) -> (i32, i32) {
    %c0_i32 = arith.constant 0 : i32
    %c0_i32_0 = arith.constant 0 : i32
    %c0_i32_1 = arith.constant 0 : i32
    return %c0_i32, %c0_i32_0 : i32, i32
  }
  func.func @transform_6(%arg0: i32) -> (i32, i32) {
    %c0_i32 = arith.constant 0 : i32
    %c0_i32_0 = arith.constant 0 : i32
    %c0_i32_1 = arith.constant 0 : i32
    return %c0_i32, %c0_i32_0 : i32, i32
  }
  func.func @transform_7(%arg0: i32) -> (i32, i32, i32) {
    %c0_i32 = arith.constant 0 : i32
    %c0_i32_0 = arith.constant 0 : i32
    %c0_i32_1 = arith.constant 0 : i32
    return %arg0, %c0_i32, %c0_i32_0 : i32, i32, i32
  }
}

</mosaic_0001>

<bundles_post_ra>
// kernel: tpu_custom_call.1
= control target key start
LH: loop header
LB: loop body
LE: loop exit
PB: predicated region body
PF: predicated region fallthrough
CT: control target
= control target key end

     0   :  { %12 = vsyncpa [#allocation5], 0  ;;  %s2697_s0 = inlined_call_operand.vmem [shape: bf16[1,64,16], index: 0, kind: input, shape index: {}]   ;;  %s2698_s1 = inlined_call_operand.hbm [shape: bf16[16,128], index: 1, kind: input, shape index: {}]   ;;  %s2699_s2 = inlined_call_operand.hbm [shape: bf16[1,128,128], index: 2, kind: input, shape index: {}]   ;;  %s2700_s3 = inlined_call_operand.vmem [shape: bf16[2,32,128], index: 3, kind: input, shape index: {}]   ;;  %s2701_s4 = inlined_call_operand.hbm [shape: f32[2,1,128], index: 4, kind: input, shape index: {}]   ;;  %s2702_s5 = inlined_call_operand.vmem [shape: bf16[32,128], index: 5, kind: input, shape index: {}]   ;;  %s2703_s6 = inlined_call_operand.vmem [shape: f32[1,128], index: 6, kind: input, shape index: {}]   ;;  %s2704_s7 = inlined_call_operand.hbm [shape: f32[1,8,128], index: 7, kind: output, shape index: {}]  }
   0x1   :  { %13 = vsyncpa [#allocation8], 0 }
   0x2   :  { %14 = vsyncpa [#allocation6], 0  ;;  %s2295_s24 = smov [#allocation7]   ;;  %s2296_s26 = smov [#allocation4]  }
   0x3   :  { %s34_s25 = sshll.u32 %s2295_s24, 4  ;;  %s22_s27 = sshll.u32 %s2296_s26, 4  ;;  %s35_s25 = int_to_ptr.vmem [resolvable:$true] %s34_s25  ;;  %s23_s27 = int_to_ptr.vmem [resolvable:$true] %s22_s27 }
   0x4   :  { %s2217_s28 = scalar_lea.vmem %s35_s25, 1024  ;;  %p2222_p1 = scmp.lt.s32.totalorder %s35_s25, %s35_s25 }
   0x5   :  { %p2218_p0 = scmp.ne.s32.totalorder %s35_s25, %s2217_s28  ;;  %p2223_p2 = scmp.lt.s32.totalorder %s2217_s28, %s2217_s28 }
   0x7   :  { %p2224_p3 = por %p2223_p2, %p2222_p1 }
   0x9   :  { %p2225_p4 = pnand %p2224_p3, %p2218_p0 }
   0xb   :  { %2228 = shalt.err (!%p2225_p4)
}
   0xc   :  { %s2297_s29 = smov 64   ;;  %s2298_s30 = smov 4  }
   0xd   :  { %40 = dma.hbm_to_vmem [thread:$0]  %s2699_s2, 1024, %s35_s25, [#allocation8], %s2297_s29, %s2297_s29, %s2298_s30  }
   0xe   :  { %s2237_s10 = scalar_lea.vmem %s23_s27, 128  ;;  %p2242_p6 = scmp.lt.s32.totalorder %s23_s27, %s23_s27 }
   0xf   :  { %p2238_p5 = scmp.ne.s32.totalorder %s23_s27, %s2237_s10  ;;  %p2243_p7 = scmp.lt.s32.totalorder %s2237_s10, %s2237_s10 }
  0x11   :  { %p2244_p8 = por %p2243_p7, %p2242_p6 }
  0x13   :  { %p2245_p9 = pnand %p2244_p8, %p2238_p5 }
  0x15   :  { %2248 = shalt.err (!%p2245_p9)
}
  0x16   :  { %28 = dma.hbm_to_vmem [thread:$0]  %s2698_s1, 128, %s23_s27, [#allocation5], %s2297_s29, %s2297_s29, %s2298_s30  }
  0x17   :  { %s2299_s13 = smov [#allocation9]  }
  0x18   :  { %s48_s14 = sshll.u32 %s2299_s13, 4  ;;  %s49_s14 = int_to_ptr.vmem [resolvable:$true] %s48_s14 }
  0x19   :  { %s2257_s15 = scalar_lea.vmem %s49_s14, 32  ;;  %p2262_p11 = scmp.lt.s32.totalorder %s49_s14, %s49_s14 }
  0x1a   :  { %p2258_p10 = scmp.ne.s32.totalorder %s49_s14, %s2257_s15  ;;  %p2263_p12 = scmp.lt.s32.totalorder %s2257_s15, %s2257_s15 }
  0x1c   :  { %p2264_p13 = por %p2263_p12, %p2262_p11 }
  0x1e   :  { %p2265_p0 = pnand %p2264_p13, %p2258_p10 }
  0x20   :  { %2268 = shalt.err (!%p2265_p0)
}
  0x21   :  { %s2300_s2 = smov 16   ;;  %s2301_s16 = smov 1  }
  0x22   :  { %54 = dma.hbm_to_vmem [thread:$0]  %s2701_s4, 32, %s49_s14, [#allocation8], %s2300_s2, %s2300_s2, %s2301_s16  }
  0x23   :  { %2289 = dma.done.wait [#allocation5], 128  }
  0x24   :  { %2290 = vsyncadd [#allocation5], 4294967168 }
  0x25   :  { %2291 = dma.done.wait [#allocation8], 1056  }
  0x26   :  { %2292 = vsyncadd [#allocation8], 4294966240  ;;  %v2302_v0 = vmov 0.0   ;;  %vm2303_vm0 = vmmov 0   ;;  %v2058_v1 = vld [vmem:[#allocation4] sm:$0xff]   ;;  %v2366_v2 = vld [vmem:[%s2700_s3 + $0x8] sm:$0xff]  }
  0x27   :  { %1866 = vmatprep.subr.bf16.mxu1 %v2302_v0  ;;  %1870 = vmatprep.mubr.msk.bf16.mxu1 %vm2303_vm0, %v2302_v0  ;;  %vm112_vm1 = vcmask 130048   ;;  %v2060_v3 = vld [vmem:[%s2697_s0] sm:$0xff]   ;;  %v2061_v4 = vld [vmem:[%s2697_s0 + $0x8] sm:$0xff]   ;;  %v2304_v6 = vmov 0   ;;  %v2399_v8 = vld [vmem:[#allocation9] ss:$0 sm:$0xff] }
  0x28   :  { %1856 = vmatprep.subr.bf16.mxu0 %v2058_v1  ;;  %1867 = vmatpush3.bf16.msra.mxu1 %v2366_v2  ;;  %v2380_v5 = vld [vmem:[%s2700_s3] sm:$0xff]   ;;  %s2305_s25 = smov 32   ;;  %vm215_vm2 = vcmask 261120   ;;  %v2063_v49 = vld [vmem:[%s2697_s0 + $0x10] sm:$0xff]   ;;  %v2064_v50 = vld [vmem:[%s2697_s0 + $0x18] sm:$0xff]   ;;  %s2306_s2 = smov [#allocation10]  }
  0x29   :  { %1857 = vmatpush3.bf16.msra.mxu0 %v2058_v1  ;;  %1858 = vmatprep.mubr.msk.bf16.mxu0 %vm112_vm1, %v2060_v3 }
  0x2a   :  { %1868 = vmatprep.subr.bf16.mxu1 %v2302_v0  ;;  %1882 = vmatprep.subr.bf16.mxu0 %v2302_v0 }
  0x2c   :  { %1859 = vmatmul.mubr.msk.bf16.vlgmr.msra.gmra.mxu0 %vm112_vm1, %v2061_v4  ;;  %1869 = vmatpush3.bf16.msra.mxu1 %v2380_v5 }
  0x2d   :  { %1883 = vmatpush3.bf16.msra.mxu0 %v2366_v2  ;;  %1874 = vmatprep.subr.bf16.mxu1 %v2302_v0 }
  0x2e   :  { %1884 = vmatprep.subr.bf16.mxu0 %v2302_v0  ;;  %1862 = vmatprep.mubr.msk.bf16.mxu0 %vm112_vm1, %v2063_v49 }
  0x2f   :  { %1871 = vmatmul.mubr.bf16.vlgmr.msra.gmra.mxu1 %v2304_v6 }
  0x30   :  { %1875 = vmatpush3.bf16.msra.mxu1 %v2366_v2  ;;  %1878 = vmatprep.mubr.msk.bf16.mxu1 %vm2303_vm0, %v2302_v0 }
  0x31   :  { %1876 = vmatprep.subr.bf16.mxu1 %v2302_v0  ;;  %1885 = vmatpush3.bf16.msra.mxu0 %v2380_v5 }
  0x32   :  { %1898 = vmatprep.subr.bf16.mxu0 %v2302_v0 }
  0x34   :  { %1877 = vmatpush3.bf16.msra.mxu1 %v2380_v5  ;;  %1863 = vmatmul.mubr.msk.bf16.gmra.mxu0 %vm112_vm1, %v2064_v50 }
  0x35   :  { %1890 = vmatprep.subr.bf16.mxu1 %v2302_v0  ;;  %1886 = vmatprep.mubr.msk.bf16.mxu0 %vm2303_vm0, %v2302_v0 }
  0xec   :  { %v2397_v7 = vpop.f32.mrf.mxu0 }
  0xed   :  { %v168_v60 = vadd.f32 %v2397_v7, %v2399_v8 }
  0xee   :  { %v159_v9 = vpop.f32.mrf.mxu0 }
  0xef   :  { %v160_v10 = vadd.f32 %v2399_v8, %v159_v9  ;;  %v253_v11 = vpop.f32.mrf.mxu1 }
  0xf0   :  { %v2417_v31 = vpop.f32.mrf.mxu0 }
  0xf1   :  { %v259_v12 = vadd.f32 %v253_v11, %v160_v10  ;;  %v1872_v13 = vpop.f32.mrf.mxu1 }
  0xf2   :  { %v162_v32 = vpop.f32.mrf.mxu0 }
  0xf3   :  { %2081 = vtanh.f32 %v259_v12  ;;  %v256_v14 = vpop.f32.mrf.mxu1  ;;  %v1735_v17 = vmul.f32 -1.442695, %v259_v12  ;;  %v163_v33 = vadd.f32 %v2399_v8, %v162_v32 }
  0xf4   :  { %v2445_v56 = vpop.f32.mrf.mxu0 }
  0xf5   :  { %v1873_v15 = vpop.f32.mrf.mxu1  ;;  %2083 = vpow2.f32 %v1735_v17 }
  0xf6   :  { %v2447_v57 = vpop.f32.mrf.mxu0 }
  0xf8   :  { %v2449_v58 = vpop.f32.mrf.mxu0 }
  0xfa   :  { %v2451_v59 = vpop.f32.mrf.mxu0 }
 0x100   :  { %v2082_v16 = vpop.eup %2081 }
 0x101   :  { %269 = vrot.lane.b32.xlu0 %v2082_v16, %s2297_s29 }
 0x102   :  { %v2084_v18 = vpop.eup %2083 }
 0x103   :  { %v263_v19 = vadd.f32 1.0, %v2084_v18 }
 0x105   :  { %2085 = vrcp.f32 %v263_v19 }
 0x112   :  { %v2086_v20 = vpop.eup %2085 }
 0x113   :  { %v267_v23 = vmul.f32 0.0, %v2086_v20 }
 0x173   :  { %v270_v21 = vpop.permute.xlu0 %269 }
 0x174   :  { %v272_v22 = vmul.f32 %v2086_v20, %v270_v21 }
 0x176   :  { %274 = vrot.lane.b32.xlu0 %v272_v22, %s2305_s25  ;;  %v171_v22 = vadd.f32 %v2417_v31, %v2399_v8 }
 0x1e8   :  { %v275_v24 = vpop.permute.xlu0 %274 }
 0x1e9   :  { %v277_v25 = vadd.f32 %v275_v24, %v267_v23 }
 0x1eb   :  { %2087 = vtanh.f32 %v277_v25 }
 0x1f8   :  { %v2088_v26 = vpop.eup %2087 }
 0x1f9   :  { %280 = vrot.lane.b32.xlu1 %v2088_v26, %s2297_s29 }
 0x26b   :  { %v281_v27 = vpop.permute.xlu1 %280 }
 0x26c   :  { %v2405_v28 = vmul.f32 %v2086_v20, %v281_v27 }
 0x26e   :  { %v293_v29 = vpack.c.bf16 %v2405_v28, %v2405_v28 }
 0x270   :  { %295 = vrot.lane.b32.xlu1 %v293_v29, %s2305_s25 }
 0x2e2   :  { %v296_v30 = vpop.permute.xlu1 %295 }
 0x2e3   :  { %1879 = vmatmul.mubr.msk.bf16.vlgmr.msra.gmra.mxu1 %vm215_vm2, %v296_v30 }
 0x2e4   :  { %1891 = vmatpush3.bf16.msra.mxu1 %v2366_v2  ;;  %1894 = vmatprep.mubr.msk.bf16.mxu1 %vm2303_vm0, %v2302_v0 }
 0x2e5   :  { %1892 = vmatprep.subr.bf16.mxu1 %v2302_v0 }
 0x2e8   :  { %1893 = vmatpush3.bf16.msra.mxu1 %v2380_v5 }
 0x2e9   :  { %1906 = vmatprep.subr.bf16.mxu1 %v2302_v0 }
 0x3a3   :  { %v334_v34 = vpop.f32.mrf.mxu1 }
 0x3a4   :  { %v340_v35 = vadd.f32 %v334_v34, %v163_v33 }
 0x3a5   :  { %v1880_v36 = vpop.f32.mrf.mxu1 }
 0x3a6   :  { %2089 = vtanh.f32 %v340_v35  ;;  %v1737_v40 = vmul.f32 -1.442695, %v340_v35 }
 0x3a7   :  { %v337_v37 = vpop.f32.mrf.mxu1 }
 0x3a8   :  { %2091 = vpow2.f32 %v1737_v40 }
 0x3a9   :  { %v1881_v38 = vpop.f32.mrf.mxu1 }
 0x3b3   :  { %v2090_v39 = vpop.eup %2089 }
 0x3b4   :  { %350 = vrot.lane.b32.xlu0 %v2090_v39, %s2297_s29 }
 0x3b5   :  { %v2092_v41 = vpop.eup %2091 }
 0x3b6   :  { %v344_v42 = vadd.f32 1.0, %v2092_v41 }
 0x3b8   :  { %2093 = vrcp.f32 %v344_v42 }
 0x3c5   :  { %v2094_v43 = vpop.eup %2093 }
 0x3c6   :  { %v348_v46 = vmul.f32 %v2094_v43, %v277_v25 }
 0x426   :  { %v351_v44 = vpop.permute.xlu0 %350 }
 0x427   :  { %v353_v45 = vmul.f32 %v2094_v43, %v351_v44  ;;  %v176_v44 = vadd.f32 %v2399_v8, %v2447_v57 }
 0x429   :  { %355 = vrot.lane.b32.xlu1 %v353_v45, %s2305_s25 }
 0x49b   :  { %v356_v47 = vpop.permute.xlu1 %355 }
 0x49c   :  { %v358_v48 = vadd.f32 %v356_v47, %v348_v46 }
 0x49e   :  { %2095 = vtanh.f32 %v358_v48 }
 0x4ab   :  { %v2096_v51 = vpop.eup %2095 }
 0x4ac   :  { %361 = vrot.lane.b32.xlu0 %v2096_v51, %s2297_s29 }
 0x51e   :  { %v362_v52 = vpop.permute.xlu0 %361 }
 0x51f   :  { %v2433_v53 = vmul.f32 %v2094_v43, %v362_v52 }
 0x521   :  { %v375_v54 = vpack.c.bf16 %v2433_v53, %v2433_v53 }
 0x523   :  { %377 = vrot.lane.b32.xlu1 %v375_v54, %s2305_s25 }
 0x595   :  { %v378_v55 = vpop.permute.xlu1 %377 }
 0x596   :  { %1887 = vmatmul.mubr.msk.bf16.vlgmr.msra.gmra.mxu0 %vm215_vm2, %v378_v55 }
 0x597   :  { %1899 = vmatpush3.bf16.msra.mxu0 %v2366_v2  ;;  %1902 = vmatprep.mubr.msk.bf16.mxu0 %vm2303_vm0, %v2302_v0 }
 0x598   :  { %1900 = vmatprep.subr.bf16.mxu0 %v2302_v0 }
 0x59b   :  { %1901 = vmatpush3.bf16.msra.mxu0 %v2380_v5 }
 0x59c   :  { %1914 = vmatprep.subr.bf16.mxu0 %v2302_v0 }
 0x656   :  { %v416_v61 = vpop.f32.mrf.mxu0 }
 0x657   :  { %v422_v62 = vadd.f32 %v416_v61, %v168_v60 }
 0x658   :  { %v1888_v63 = vpop.f32.mrf.mxu0 }
 0x659   :  { %2097 = vtanh.f32 %v422_v62  ;;  %v1739_v9 = vmul.f32 -1.442695, %v422_v62 }
 0x65a   :  { %v419_v1 = vpop.f32.mrf.mxu0 }
 0x65b   :  { %2099 = vpow2.f32 %v1739_v9 }
 0x65c   :  { %v1889_v3 = vpop.f32.mrf.mxu0 }
 0x666   :  { %v2098_v4 = vpop.eup %2097 }
 0x667   :  { %432 = vrot.lane.b32.xlu0 %v2098_v4, %s2297_s29 }
 0x668   :  { %v2100_v10 = vpop.eup %2099 }
 0x669   :  { %v426_v11 = vadd.f32 1.0, %v2100_v10 }
 0x66b   :  { %2101 = vrcp.f32 %v426_v11  ;;  %v179_v11 = vadd.f32 %v2399_v8, %v2451_v59 }
 0x678   :  { %v2102_v12 = vpop.eup %2101 }
 0x679   :  { %v430_v7 = vmul.f32 %v2102_v12, %v358_v48 }
 0x6d9   :  { %v433_v13 = vpop.permute.xlu0 %432 }
 0x6da   :  { %v435_v14 = vmul.f32 %v2102_v12, %v433_v13 }
 0x6dc   :  { %437 = vrot.lane.b32.xlu1 %v435_v14, %s2305_s25 }
 0x74e   :  { %v438_v15 = vpop.permute.xlu1 %437 }
 0x74f   :  { %v440_v16 = vadd.f32 %v438_v15, %v430_v7 }
 0x751   :  { %2103 = vtanh.f32 %v440_v16 }
 0x75e   :  { %v2104_v17 = vpop.eup %2103 }
 0x75f   :  { %443 = vrot.lane.b32.xlu0 %v2104_v17, %s2297_s29 }
 0x7d1   :  { %v444_v18 = vpop.permute.xlu0 %443 }
 0x7d2   :  { %v2458_v19 = vmul.f32 %v2102_v12, %v444_v18 }
 0x7d4   :  { %v457_v20 = vpack.c.bf16 %v2458_v19, %v2458_v19 }
 0x7d6   :  { %459 = vrot.lane.b32.xlu1 %v457_v20, %s2305_s25 }
 0x848   :  { %v460_v21 = vpop.permute.xlu1 %459 }
 0x849   :  { %1895 = vmatmul.mubr.msk.bf16.vlgmr.msra.gmra.mxu1 %vm215_vm2, %v460_v21 }
 0x84a   :  { %1907 = vmatpush3.bf16.msra.mxu1 %v2366_v2  ;;  %1910 = vmatprep.mubr.msk.bf16.mxu1 %vm2303_vm0, %v2302_v0 }
 0x84b   :  { %1908 = vmatprep.subr.bf16.mxu1 %v2302_v0 }
 0x84e   :  { %1909 = vmatpush3.bf16.msra.mxu1 %v2380_v5 }
 0x84f   :  { %1922 = vmatprep.subr.bf16.mxu1 %v2302_v0 }
 0x909   :  { %v498_v23 = vpop.f32.mrf.mxu1 }
 0x90a   :  { %v504_v24 = vadd.f32 %v498_v23, %v171_v22 }
 0x90b   :  { %v1896_v25 = vpop.f32.mrf.mxu1 }
 0x90c   :  { %2105 = vtanh.f32 %v504_v24  ;;  %v1741_v30 = vmul.f32 -1.442695, %v504_v24 }
 0x90d   :  { %v501_v26 = vpop.f32.mrf.mxu1 }
 0x90e   :  { %2107 = vpow2.f32 %v1741_v30  ;;  %v184_v30 = vadd.f32 %v2445_v56, %v2399_v8  ;;  %v2038_v56 = vpack.i.bf16 %v2433_v53, %v2405_v28 }
 0x90f   :  { %v1897_v27 = vpop.f32.mrf.mxu1 }
 0x919   :  { %v2106_v29 = vpop.eup %2105 }
 0x91a   :  { %514 = vrot.lane.b32.xlu0 %v2106_v29, %s2297_s29 }
 0x91b   :  { %v2108_v32 = vpop.eup %2107 }
 0x91c   :  { %v508_v33 = vadd.f32 1.0, %v2108_v32 }
 0x91e   :  { %2109 = vrcp.f32 %v508_v33 }
 0x92b   :  { %v2110_v34 = vpop.eup %2109 }
 0x92c   :  { %v512_v31 = vmul.f32 %v2110_v34, %v440_v16 }
 0x98c   :  { %v515_v35 = vpop.permute.xlu0 %514 }
 0x98d   :  { %v517_v36 = vmul.f32 %v2110_v34, %v515_v35 }
 0x98f   :  { %519 = vrot.lane.b32.xlu1 %v517_v36, %s2305_s25 }
 0xa01   :  { %v520_v37 = vpop.permute.xlu1 %519 }
 0xa02   :  { %v522_v38 = vadd.f32 %v520_v37, %v512_v31 }
 0xa04   :  { %2111 = vtanh.f32 %v522_v38 }
 0xa11   :  { %v2112_v39 = vpop.eup %2111 }
 0xa12   :  { %525 = vrot.lane.b32.xlu0 %v2112_v39, %s2297_s29 }
 0xa84   :  { %v526_v40 = vpop.permute.xlu0 %525 }
 0xa85   :  { %v2475_v41 = vmul.f32 %v2110_v34, %v526_v40 }
 0xa87   :  { %v539_v42 = vpack.c.bf16 %v2475_v41, %v2475_v41 }
 0xa89   :  { %541 = vrot.lane.b32.xlu1 %v539_v42, %s2305_s25 }
 0xafb   :  { %v542_v43 = vpop.permute.xlu1 %541 }
 0xafc   :  { %1903 = vmatmul.mubr.msk.bf16.vlgmr.msra.gmra.mxu0 %vm215_vm2, %v542_v43 }
 0xafd   :  { %1915 = vmatpush3.bf16.msra.mxu0 %v2366_v2  ;;  %1918 = vmatprep.mubr.msk.bf16.mxu0 %vm2303_vm0, %v2302_v0 }
 0xafe   :  { %1916 = vmatprep.subr.bf16.mxu0 %v2302_v0 }
 0xb01   :  { %1917 = vmatpush3.bf16.msra.mxu0 %v2380_v5 }
 0xbbc   :  { %v580_v45 = vpop.f32.mrf.mxu0 }
 0xbbd   :  { %v586_v46 = vadd.f32 %v580_v45, %v176_v44  ;;  %v2066_v44 = vld [vmem:[#allocation7 + $0x38] sm:$0xff]   ;;  %v2067_v45 = vld [vmem:[#allocation7 + $0x30] sm:$0xff]  }
 0xbbe   :  { %v1904_v47 = vpop.f32.mrf.mxu0  ;;  %1930 = vmatprep.subr.bf16.mxu0 %v2066_v44 }
 0xbbf   :  { %2113 = vtanh.f32 %v586_v46  ;;  %v1743_v51 = vmul.f32 -1.442695, %v586_v46  ;;  %v2068_v46 = vld [vmem:[#allocation7 + $0x28] sm:$0xff]   ;;  %v2069_v47 = vld [vmem:[#allocation7 + $0x20] sm:$0xff]  }
 0xbc0   :  { %v583_v48 = vpop.f32.mrf.mxu0 }
 0xbc1   :  { %2115 = vpow2.f32 %v1743_v51 }
 0xbc2   :  { %v1905_v49 = vpop.f32.mrf.mxu0 }
 0xbcc   :  { %v2114_v50 = vpop.eup %2113 }
 0xbcd   :  { %596 = vrot.lane.b32.xlu0 %v2114_v50, %s2297_s29 }
 0xbce   :  { %v2116_v52 = vpop.eup %2115 }
 0xbcf   :  { %v590_v54 = vadd.f32 1.0, %v2116_v52  ;;  %v2070_v52 = vld [vmem:[#allocation7 + $0x18] sm:$0xff]  }
 0xbd1   :  { %2117 = vrcp.f32 %v590_v54 }
 0xbde   :  { %v2118_v55 = vpop.eup %2117 }
 0xbdf   :  { %v594_v57 = vmul.f32 %v2118_v55, %v522_v38 }
 0xc3f   :  { %v597_v60 = vpop.permute.xlu0 %596 }
 0xc40   :  { %v599_v61 = vmul.f32 %v2118_v55, %v597_v60 }
 0xc42   :  { %601 = vrot.lane.b32.xlu1 %v599_v61, %s2305_s25 }
 0xcb4   :  { %v602_v62 = vpop.permute.xlu1 %601 }
 0xcb5   :  { %v604_v63 = vadd.f32 %v602_v62, %v594_v57  ;;  %v2071_v57 = vld [vmem:[#allocation7 + $0x10] sm:$0xff]   ;;  %v2072_v62 = vld [vmem:[#allocation7 + $0x8] sm:$0xff]  }
 0xcb7   :  { %2119 = vtanh.f32 %v604_v63 }
 0xcc4   :  { %v2120_v1 = vpop.eup %2119 }
 0xcc5   :  { %607 = vrot.lane.b32.xlu0 %v2120_v1, %s2297_s29 }
 0xd37   :  { %v608_v3 = vpop.permute.xlu0 %607 }
 0xd38   :  { %v2491_v4 = vmul.f32 %v2118_v55, %v608_v3 }
 0xd3a   :  { %v621_v9 = vpack.c.bf16 %v2491_v4, %v2491_v4 }
 0xd3c   :  { %623 = vrot.lane.b32.xlu1 %v621_v9, %s2305_s25  ;;  %v2043_v9 = vpack.i.bf16 %v2475_v41, %v2458_v19 }
 0xdae   :  { %v624_v10 = vpop.permute.xlu1 %623 }
 0xdaf   :  { %1911 = vmatmul.mubr.msk.bf16.vlgmr.msra.gmra.mxu1 %vm215_vm2, %v624_v10 }
 0xdb0   :  { %1923 = vmatpush3.bf16.msra.mxu1 %v2366_v2  ;;  %1926 = vmatprep.mubr.msk.bf16.mxu1 %vm2303_vm0, %v2302_v0 }
 0xdb1   :  { %1924 = vmatprep.subr.bf16.mxu1 %v2302_v0 }
 0xdb4   :  { %1925 = vmatpush3.bf16.msra.mxu1 %v2380_v5 }
 0xdb5   :  { %1954 = vmatprep.subr.bf16.mxu1 %v2302_v0 }
 0xe6f   :  { %v662_v12 = vpop.f32.mrf.mxu1 }
 0xe70   :  { %v668_v13 = vadd.f32 %v662_v12, %v179_v11 }
 0xe71   :  { %v1912_v14 = vpop.f32.mrf.mxu1 }
 0xe72   :  { %2121 = vtanh.f32 %v668_v13  ;;  %v1745_v2 = vmul.f32 -1.442695, %v668_v13 }
 0xe73   :  { %v665_v7 = vpop.f32.mrf.mxu1 }
 0xe74   :  { %2123 = vpow2.f32 %v1745_v2 }
 0xe75   :  { %v1913_v15 = vpop.f32.mrf.mxu1 }
 0xe7f   :  { %v2122_v16 = vpop.eup %2121 }
 0xe80   :  { %678 = vrot.lane.b32.xlu0 %v2122_v16, %s2297_s29 }
 0xe81   :  { %v2124_v17 = vpop.eup %2123 }
 0xe82   :  { %v672_v18 = vadd.f32 1.0, %v2124_v17  ;;  %v2541_v17 = vld [vmem:[%s2700_s3 + $0x18] sm:$0xff]  }
 0xe84   :  { %2125 = vrcp.f32 %v672_v18  ;;  %v2548_v18 = vld [vmem:[%s2700_s3 + $0x10] sm:$0xff]  }
 0xe91   :  { %v2126_v5 = vpop.eup %2125 }
 0xe92   :  { %v676_v59 = vmul.f32 %v2126_v5, %v604_v63  ;;  %v2073_v63 = vld [vmem:[#allocation7] sm:$0xff]  }
 0xef2   :  { %v679_v20 = vpop.permute.xlu0 %678 }
 0xef3   :  { %v681_v21 = vmul.f32 %v2126_v5, %v679_v20  ;;  %v187_v20 = vadd.f32 %v2449_v58, %v2399_v8 }
 0xef5   :  { %683 = vrot.lane.b32.xlu1 %v681_v21, %s2305_s25 }
 0xf67   :  { %v684_v22 = vpop.permute.xlu1 %683 }
 0xf68   :  { %v686_v23 = vadd.f32 %v684_v22, %v676_v59 }
 0xf6a   :  { %2127 = vtanh.f32 %v686_v23 }
 0xf77   :  { %v2128_v24 = vpop.eup %2127 }
 0xf78   :  { %689 = vrot.lane.b32.xlu0 %v2128_v24, %s2297_s29 }
 0xfea   :  { %v690_v25 = vpop.permute.xlu0 %689 }
 0xfeb   :  { %v2508_v26 = vmul.f32 %v2126_v5, %v690_v25  ;;  %v2572_v25 = vld [vmem:[#allocation9 + $0x1] ss:$0 sm:$0xff] }
 0xfed   :  { %v703_v27 = vpack.c.bf16 %v2508_v26, %v2508_v26 }
 0xfef   :  { %705 = vrot.lane.b32.xlu1 %v703_v27, %s2305_s25 }
0x1061   :  { %v706_v29 = vpop.permute.xlu1 %705 }
0x1062   :  { %1919 = vmatmul.mubr.msk.bf16.vlgmr.msra.gmra.mxu0 %vm215_vm2, %v706_v29 }
0x1063   :  { %1931 = vmatpush3.bf16.msra.mxu0 %v2066_v44 }
0x1064   :  { %1932 = vmatprep.subr.bf16.mxu0 %v2067_v45 }
0x1067   :  { %1933 = vmatpush3.bf16.msra.mxu0 %v2067_v45 }
0x1068   :  { %1934 = vmatprep.subr.bf16.mxu0 %v2068_v46 }
0x106b   :  { %1935 = vmatpush3.bf16.msra.mxu0 %v2068_v46 }
0x106c   :  { %1936 = vmatprep.subr.bf16.mxu0 %v2069_v47 }
0x106f   :  { %1937 = vmatpush3.bf16.msra.mxu0 %v2069_v47 }
0x1070   :  { %1938 = vmatprep.subr.bf16.mxu0 %v2070_v52 }
0x1073   :  { %1939 = vmatpush3.bf16.msra.mxu0 %v2070_v52 }
0x1074   :  { %1940 = vmatprep.subr.bf16.mxu0 %v2071_v57 }
0x1077   :  { %1941 = vmatpush3.bf16.msra.mxu0 %v2071_v57 }
0x1078   :  { %1942 = vmatprep.subr.bf16.mxu0 %v2072_v62 }
0x107b   :  { %1943 = vmatpush3.bf16.msra.mxu0 %v2072_v62 }
0x107c   :  { %1944 = vmatprep.subr.bf16.mxu0 %v2073_v63 }
0x107f   :  { %1945 = vmatpush3.bf16.msra.mxu0 %v2073_v63 }
0x1080   :  { %1994 = vmatprep.subr.bf16.mxu0 %v2302_v0 }
0x1122   :  { %v744_v32 = vpop.f32.mrf.mxu0 }
0x1123   :  { %v750_v33 = vadd.f32 %v744_v32, %v184_v30 }
0x1124   :  { %v1920_v34 = vpop.f32.mrf.mxu0 }
0x1125   :  { %2129 = vtanh.f32 %v750_v33  ;;  %v1747_v37 = vmul.f32 -1.442695, %v750_v33 }
0x1126   :  { %v747_v35 = vpop.f32.mrf.mxu0 }
0x1127   :  { %2131 = vpow2.f32 %v1747_v37 }
0x1128   :  { %v1921_v36 = vpop.f32.mrf.mxu0 }
0x1132   :  { %v2130_v31 = vpop.eup %2129 }
0x1133   :  { %760 = vrot.lane.b32.xlu0 %v2130_v31, %s2297_s29 }
0x1134   :  { %v2132_v38 = vpop.eup %2131 }
0x1135   :  { %v754_v39 = vadd.f32 1.0, %v2132_v38 }
0x1137   :  { %2133 = vrcp.f32 %v754_v39 }
0x1144   :  { %v2134_v40 = vpop.eup %2133 }
0x1145   :  { %v758_v48 = vmul.f32 %v2134_v40, %v686_v23 }
0x11a5   :  { %v761_v42 = vpop.permute.xlu0 %760 }
0x11a6   :  { %v763_v43 = vmul.f32 %v2134_v40, %v761_v42 }
0x11a8   :  { %765 = vrot.lane.b32.xlu1 %v763_v43, %s2305_s25 }
0x11ac   :  { %2039 = vrot.lane.b32.xlu1 %v2038_v56, %s2305_s25 }
0x121a   :  { %v766_v49 = vpop.permute.xlu1 %765 }
0x121b   :  { %v2521_v50 = vadd.f32 %v766_v49, %v758_v48 }
0x121d   :  { %2135 = vtanh.f32 %v2521_v50 }
0x121e   :  { %v2040_v28 = vpop.permute.xlu1 %2039 }
0x121f   :  { %v2042_v53 = vunpack.i.h.bf16 %v2040_v28  ;;  %v2041_v51 = vunpack.i.l.bf16 %v2040_v28 }
0x1221   :  { %v369_v54 = vsel %vm215_vm2, %v2042_v53, 0.0  ;;  %v288_v55 = vsel %vm215_vm2, %v2041_v51, 0.0 }
0x1222   :  { %v370_v60 = vpack.c.bf16 %v369_v54, %v369_v54  ;;  %v289_v61 = vpack.c.bf16 %v288_v55, %v288_v55 }
0x1224   :  { %372 = vst [vmem:[#allocation3 + $0x4] sm:$0xf] %v370_v60  ;;  %290 = vst [vmem:[#allocation3] sm:$0xf] %v289_v61 }
0x122a   :  { %v2136_v1 = vpop.eup %2135 }
0x122b   :  { %771 = vrot.lane.b32.xlu0 %v2136_v1, %s2297_s29  ;;  %v2065_v3 = vld [vmem:[#allocation3] sm:$0xff]  }
0x122c   :  { %1946 = vmatprep.mubr.bf16.mxu0 %v2065_v3 }
0x122f   :  { %2044 = vrot.lane.b32.xlu0 %v2043_v9, %s2305_s25 }
0x129d   :  { %v772_v10 = vpop.permute.xlu0 %771 }
0x129e   :  { %v2531_v11 = vmul.f32 %v2134_v40, %v772_v10 }
0x12a0   :  { %v785_v12 = vpack.c.bf16 %v2531_v11, %v2531_v11 }
0x12a1   :  { %v2045_v13 = vpop.permute.xlu0 %2044 }
0x12a2   :  { %v2047_v14 = vunpack.i.h.bf16 %v2045_v13  ;;  %v2046_v7 = vunpack.i.l.bf16 %v2045_v13  ;;  %787 = vrot.lane.b32.xlu1 %v785_v12, %s2305_s25 }
0x12a4   :  { %v533_v15 = vsel %vm215_vm2, %v2047_v14, 0.0  ;;  %v451_v19 = vsel %vm215_vm2, %v2046_v7, 0.0 }
0x12a5   :  { %v534_v41 = vpack.c.bf16 %v533_v15, %v533_v15  ;;  %v452_v16 = vpack.c.bf16 %v451_v19, %v451_v19 }
0x12a7   :  { %536 = vst [vmem:[#allocation3 + $0xc] sm:$0xf] %v534_v41  ;;  %454 = vst [vmem:[#allocation3 + $0x8] sm:$0xf] %v452_v16 }
0x12ae   :  { %v2074_v2 = vld [vmem:[#allocation3 + $0x8] sm:$0xff]  }
0x12af   :  { %1947 = vmatmul.mubr.bf16.vlgmr.msra.gmra.mxu0 %v2074_v2 }
0x12b0   :  { %1995 = vmatpush3.bf16.msra.mxu0 %v2541_v17 }
0x12b1   :  { %1996 = vmatprep.subr.bf16.mxu0 %v2302_v0 }
0x12b4   :  { %1997 = vmatpush3.bf16.msra.mxu0 %v2548_v18 }
0x12b5   :  { %2010 = vmatprep.subr.bf16.mxu0 %v2302_v0 }
0x1314   :  { %v788_v5 = vpop.permute.xlu1 %787 }
0x1315   :  { %1927 = vmatmul.mubr.msk.bf16.vlgmr.msra.gmra.mxu1 %vm215_vm2, %v788_v5 }
0x1316   :  { %1955 = vmatpush3.bf16.msra.mxu1 %v2541_v17  ;;  %1958 = vmatprep.mubr.msk.bf16.mxu1 %vm2303_vm0, %v2302_v0 }
0x1317   :  { %1956 = vmatprep.subr.bf16.mxu1 %v2302_v0 }
0x131a   :  { %1957 = vmatpush3.bf16.msra.mxu1 %v2548_v18 }
0x131b   :  { %1962 = vmatprep.subr.bf16.mxu1 %v2302_v0 }
0x131d   :  { %1959 = vmatmul.mubr.bf16.vlgmr.msra.gmra.mxu1 %v2304_v6 }
0x131e   :  { %1963 = vmatpush3.bf16.msra.mxu1 %v2541_v17  ;;  %1966 = vmatprep.mubr.msk.bf16.mxu1 %vm2303_vm0, %v2302_v0 }
0x131f   :  { %1964 = vmatprep.subr.bf16.mxu1 %v2302_v0 }
0x1322   :  { %1965 = vmatpush3.bf16.msra.mxu1 %v2548_v18 }
0x1323   :  { %1970 = vmatprep.subr.bf16.mxu1 %v2302_v0 }
0x136f   :  { %v2568_v21 = vpop.f32.mrf.mxu0 }
0x1370   :  { %v1012_v41 = vadd.f32 %v2568_v21, %v2572_v25 }
0x1371   :  { %v1003_v23 = vpop.f32.mrf.mxu0 }
0x1372   :  { %v1004_v29 = vadd.f32 %v2572_v25, %v1003_v23 }
0x1373   :  { %v2586_v48 = vpop.f32.mrf.mxu0 }
0x1375   :  { %v1006_v49 = vpop.f32.mrf.mxu0 }
0x1376   :  { %v1007_v28 = vadd.f32 %v2572_v25, %v1006_v49 }
0x13d5   :  { %v826_v59 = vpop.f32.mrf.mxu1 }
0x13d6   :  { %v2570_v22 = vadd.f32 %v826_v59, %v187_v20 }
0x13d7   :  { %v1928_v6 = vpop.f32.mrf.mxu1 }
0x13d9   :  { %v829_v24 = vpop.f32.mrf.mxu1 }
0x13db   :  { %v1929_v27 = vpop.f32.mrf.mxu1 }
0x13dd   :  { %v1094_v30 = vpop.f32.mrf.mxu1 }
0x13de   :  { %v1100_v32 = vadd.f32 %v1094_v30, %v1004_v29 }
0x13df   :  { %v1960_v33 = vpop.f32.mrf.mxu1 }
0x13e0   :  { %2137 = vtanh.f32 %v1100_v32  ;;  %v1769_v58 = vmul.f32 -1.442695, %v1100_v32 }
0x13e1   :  { %v1097_v34 = vpop.f32.mrf.mxu1 }
0x13e2   :  { %2139 = vpow2.f32 %v1769_v58  ;;  %v1749_v58 = vmul.f32 -1.442695, %v2570_v22 }
0x13e3   :  { %v1961_v35 = vpop.f32.mrf.mxu1 }
0x13ed   :  { %v2138_v8 = vpop.eup %2137 }
0x13ee   :  { %1110 = vrot.lane.b32.xlu0 %v2138_v8, %s2297_s29 }
0x13ef   :  { %v2140_v36 = vpop.eup %2139 }
0x13f0   :  { %v1104_v31 = vadd.f32 1.0, %v2140_v36 }
0x13f2   :  { %2141 = vrcp.f32 %v1104_v31 }
0x13ff   :  { %v2142_v37 = vpop.eup %2141 }
0x1400   :  { %v1108_v40 = vmul.f32 0.0, %v2142_v37 }
0x1460   :  { %v1111_v38 = vpop.permute.xlu0 %1110 }
0x1461   :  { %v1113_v39 = vmul.f32 %v2142_v37, %v1111_v38 }
0x1463   :  { %1115 = vrot.lane.b32.xlu1 %v1113_v39, %s2305_s25 }
0x14d5   :  { %v1116_v42 = vpop.permute.xlu1 %1115 }
0x14d6   :  { %v1118_v43 = vadd.f32 %v1116_v42, %v1108_v40 }
0x14d8   :  { %2143 = vtanh.f32 %v1118_v43 }
0x14e5   :  { %v2144_v56 = vpop.eup %2143 }
0x14e6   :  { %1121 = vrot.lane.b32.xlu0 %v2144_v56, %s2297_s29 }
0x1558   :  { %v1122_v44 = vpop.permute.xlu0 %1121 }
0x1559   :  { %v1124_v45 = vmul.f32 %v2142_v37, %v1122_v44 }
0x155b   :  { %v1126_v46 = vpack.c.bf16 %v1124_v45, %v1124_v45 }
0x155d   :  { %1128 = vrot.lane.b32.xlu1 %v1126_v46, %s2305_s25 }
0x15cf   :  { %v1129_v47 = vpop.permute.xlu1 %1128 }
0x15d0   :  { %1967 = vmatmul.mubr.msk.bf16.vlgmr.msra.gmra.mxu1 %vm215_vm2, %v1129_v47 }
0x15d1   :  { %1971 = vmatpush3.bf16.msra.mxu1 %v2541_v17  ;;  %1974 = vmatprep.mubr.msk.bf16.mxu1 %vm2303_vm0, %v2302_v0 }
0x15d2   :  { %1972 = vmatprep.subr.bf16.mxu1 %v2302_v0 }
0x15d5   :  { %1973 = vmatpush3.bf16.msra.mxu1 %v2548_v18 }
0x15d6   :  { %1978 = vmatprep.subr.bf16.mxu1 %v2302_v0 }
0x1690   :  { %v1167_v53 = vpop.f32.mrf.mxu1 }
0x1691   :  { %v1173_v51 = vadd.f32 %v1167_v53, %v1007_v28 }
0x1692   :  { %v1968_v52 = vpop.f32.mrf.mxu1 }
0x1693   :  { %2145 = vtanh.f32 %v1173_v51  ;;  %v1771_v61 = vmul.f32 -1.442695, %v1173_v51 }
0x1694   :  { %v1170_v54 = vpop.f32.mrf.mxu1 }
0x1695   :  { %2147 = vpow2.f32 %v1771_v61  ;;  %v1015_v61 = vadd.f32 %v2586_v48, %v2572_v25 }
0x1696   :  { %v1969_v55 = vpop.f32.mrf.mxu1 }
0x16a0   :  { %v2146_v60 = vpop.eup %2145 }
0x16a1   :  { %1183 = vrot.lane.b32.xlu0 %v2146_v60, %s2297_s29 }
0x16a2   :  { %v2148_v57 = vpop.eup %2147 }
0x16a3   :  { %v1177_v62 = vadd.f32 1.0, %v2148_v57 }
0x16a5   :  { %2149 = vrcp.f32 %v1177_v62 }
0x16b2   :  { %v2150_v63 = vpop.eup %2149 }
0x16b3   :  { %v1181_v9 = vmul.f32 %v2150_v63, %v1118_v43 }
0x1713   :  { %v1184_v1 = vpop.permute.xlu0 %1183 }
0x1714   :  { %v1186_v3 = vmul.f32 %v2150_v63, %v1184_v1 }
0x1716   :  { %1188 = vrot.lane.b32.xlu1 %v1186_v3, %s2305_s25 }
0x1788   :  { %v1189_v10 = vpop.permute.xlu1 %1188 }
0x1789   :  { %v1191_v12 = vadd.f32 %v1189_v10, %v1181_v9 }
0x178b   :  { %2151 = vtanh.f32 %v1191_v12 }
0x1798   :  { %v2152_v13 = vpop.eup %2151 }
0x1799   :  { %1194 = vrot.lane.b32.xlu0 %v2152_v13, %s2297_s29 }
0x180b   :  { %v1195_v14 = vpop.permute.xlu0 %1194 }
0x180c   :  { %v1197_v7 = vmul.f32 %v2150_v63, %v1195_v14 }
0x180e   :  { %v1199_v15 = vpack.c.bf16 %v1197_v7, %v1197_v7 }
0x1810   :  { %1201 = vrot.lane.b32.xlu1 %v1199_v15, %s2305_s25 }
0x1882   :  { %v1202_v19 = vpop.permute.xlu1 %1201 }
0x1883   :  { %1975 = vmatmul.mubr.msk.bf16.vlgmr.msra.gmra.mxu1 %vm215_vm2, %v1202_v19 }
0x1884   :  { %1979 = vmatpush3.bf16.msra.mxu1 %v2541_v17  ;;  %1982 = vmatprep.mubr.msk.bf16.mxu1 %vm2303_vm0, %v2302_v0 }
0x1885   :  { %1980 = vmatprep.subr.bf16.mxu1 %v2302_v0 }
0x1888   :  { %1981 = vmatpush3.bf16.msra.mxu1 %v2548_v18 }
0x1889   :  { %1986 = vmatprep.subr.bf16.mxu1 %v2302_v0 }
0x1943   :  { %v1240_v16 = vpop.f32.mrf.mxu1 }
0x1944   :  { %v1246_v2 = vadd.f32 %v1240_v16, %v1012_v41 }
0x1945   :  { %v1976_v5 = vpop.f32.mrf.mxu1 }
0x1946   :  { %2153 = vtanh.f32 %v1246_v2  ;;  %v1773_v23 = vmul.f32 -1.442695, %v1246_v2 }
0x1947   :  { %v1243_v20 = vpop.f32.mrf.mxu1 }
0x1948   :  { %2155 = vpow2.f32 %v1773_v23 }
0x1949   :  { %v1977_v59 = vpop.f32.mrf.mxu1 }
0x1953   :  { %v2154_v6 = vpop.eup %2153 }
0x1954   :  { %1256 = vrot.lane.b32.xlu0 %v2154_v6, %s2297_s29 }
0x1955   :  { %v2156_v24 = vpop.eup %2155 }
0x1956   :  { %v1250_v27 = vadd.f32 1.0, %v2156_v24 }
0x1958   :  { %2157 = vrcp.f32 %v1250_v27 }
0x1965   :  { %v2158_v29 = vpop.eup %2157 }
0x1966   :  { %v1254_v21 = vmul.f32 %v2158_v29, %v1191_v12 }
0x19c6   :  { %v1257_v30 = vpop.permute.xlu0 %1256 }
0x19c7   :  { %v1259_v32 = vmul.f32 %v2158_v29, %v1257_v30 }
0x19c9   :  { %1261 = vrot.lane.b32.xlu1 %v1259_v32, %s2305_s25 }
0x1a3b   :  { %v1262_v33 = vpop.permute.xlu1 %1261 }
0x1a3c   :  { %v2604_v34 = vadd.f32 %v1262_v33, %v1254_v21 }
0x1a3e   :  { %2159 = vtanh.f32 %v2604_v34 }
0x1a3f   :  { %2161 = vtanh.f32 %v2570_v22 }
0x1a40   :  { %2163 = vpow2.f32 %v1749_v58 }
0x1a4b   :  { %v2160_v35 = vpop.eup %2159 }
0x1a4c   :  { %1267 = vrot.lane.b32.xlu0 %v2160_v35, %s2297_s29  ;;  %v2162_v8 = vpop.eup %2161 }
0x1a4d   :  { %v2164_v36 = vpop.eup %2163 }
0x1a4e   :  { %v836_v31 = vadd.f32 1.0, %v2164_v36 }
0x1a50   :  { %842 = vrot.lane.b32.xlu0 %v2162_v8, %s2297_s29  ;;  %2165 = vrcp.f32 %v836_v31 }
0x1a5d   :  { %v2166_v40 = vpop.eup %2165 }
0x1a5e   :  { %v840_v44 = vmul.f32 %v2166_v40, %v2521_v50  ;;  %v2048_v50 = vpack.i.bf16 %v2508_v26, %v2491_v4 }
0x1abe   :  { %v1268_v37 = vpop.permute.xlu0 %1267 }
0x1abf   :  { %v1270_v38 = vmul.f32 %v2158_v29, %v1268_v37 }
0x1ac1   :  { %v1272_v39 = vpack.c.bf16 %v1270_v38, %v1270_v38 }
0x1ac2   :  { %v843_v42 = vpop.permute.xlu0 %842 }
0x1ac3   :  { %v845_v43 = vmul.f32 %v2166_v40, %v843_v42  ;;  %1274 = vrot.lane.b32.xlu1 %v1272_v39, %s2305_s25 }
0x1ac5   :  { %847 = vrot.lane.b32.xlu0 %v845_v43, %s2305_s25 }
0x1b35   :  { %v1275_v56 = vpop.permute.xlu1 %1274 }
0x1b36   :  { %1983 = vmatmul.mubr.msk.bf16.vlgmr.msra.gmra.mxu1 %vm215_vm2, %v1275_v56 }
0x1b37   :  { %v848_v22 = vpop.permute.xlu0 %847  ;;  %1987 = vmatpush3.bf16.msra.mxu1 %v2541_v17  ;;  %1990 = vmatprep.mubr.msk.bf16.mxu1 %vm2303_vm0, %v2302_v0 }
0x1b38   :  { %v850_v45 = vadd.f32 %v848_v22, %v840_v44  ;;  %1988 = vmatprep.subr.bf16.mxu1 %v2302_v0 }
0x1b3a   :  { %2167 = vtanh.f32 %v850_v45 }
0x1b3b   :  { %1989 = vmatpush3.bf16.msra.mxu1 %v2548_v18 }
0x1b3c   :  { %2002 = vmatprep.subr.bf16.mxu1 %v2302_v0 }
0x1b47   :  { %v2168_v46 = vpop.eup %2167 }
0x1b48   :  { %853 = vrot.lane.b32.xlu0 %v2168_v46, %s2297_s29 }
0x1b4c   :  { %2049 = vrot.lane.b32.xlu0 %v2048_v50, %s2305_s25 }
0x1bba   :  { %v854_v47 = vpop.permute.xlu0 %853 }
0x1bbb   :  { %v856_v19 = vmul.f32 %v2166_v40, %v854_v47 }
0x1bbd   :  { %v2053_v16 = vpack.i.bf16 %v856_v19, %v2531_v11 }
0x1bbe   :  { %v2050_v49 = vpop.permute.xlu0 %2049 }
0x1bbf   :  { %v2052_v28 = vunpack.i.h.bf16 %v2050_v49  ;;  %v2051_v53 = vunpack.i.l.bf16 %v2050_v49 }
0x1bc1   :  { %v697_v51 = vsel %vm215_vm2, %v2052_v28, 0.0  ;;  %v615_v52 = vsel %vm215_vm2, %v2051_v53, 0.0 }
0x1bc2   :  { %v698_v54 = vpack.c.bf16 %v697_v51, %v697_v51  ;;  %v616_v55 = vpack.c.bf16 %v615_v52, %v615_v52 }
0x1bc4   :  { %700 = vst [vmem:[#allocation3 + $0x14] sm:$0xf] %v698_v54  ;;  %618 = vst [vmem:[#allocation3 + $0x10] sm:$0xf] %v616_v55 }
0x1bcb   :  { %v2077_v60 = vld [vmem:[#allocation3 + $0x10] sm:$0xff]  }
0x1bcc   :  { %1950 = vmatprep.mubr.bf16.mxu0 %v2077_v60 }
0x1bf6   :  { %v1313_v4 = vpop.f32.mrf.mxu1 }
0x1bf7   :  { %v1319_v26 = vadd.f32 %v1313_v4, %v1015_v61 }
0x1bf8   :  { %v1984_v57 = vpop.f32.mrf.mxu1 }
0x1bf9   :  { %2169 = vtanh.f32 %v1319_v26  ;;  %v1775_v3 = vmul.f32 -1.442695, %v1319_v26 }
0x1bfa   :  { %v1316_v62 = vpop.f32.mrf.mxu1 }
0x1bfb   :  { %2171 = vpow2.f32 %v1775_v3 }
0x1bfc   :  { %v1985_v63 = vpop.f32.mrf.mxu1 }
0x1c06   :  { %v2170_v1 = vpop.eup %2169 }
0x1c07   :  { %1329 = vrot.lane.b32.xlu1 %v2170_v1, %s2297_s29 }
0x1c08   :  { %v2172_v9 = vpop.eup %2171 }
0x1c09   :  { %v1323_v10 = vadd.f32 1.0, %v2172_v9 }
0x1c0b   :  { %2173 = vrcp.f32 %v1323_v10 }
0x1c18   :  { %v2174_v12 = vpop.eup %2173 }
0x1c19   :  { %v1327_v48 = vmul.f32 %v2174_v12, %v2604_v34 }
0x1c79   :  { %v1330_v13 = vpop.permute.xlu1 %1329 }
0x1c7a   :  { %v1332_v14 = vmul.f32 %v2174_v12, %v1330_v13 }
0x1c7c   :  { %1334 = vrot.lane.b32.xlu1 %v1332_v14, %s2305_s25 }
0x1cee   :  { %v1335_v7 = vpop.permute.xlu1 %1334 }
0x1cef   :  { %v1337_v15 = vadd.f32 %v1335_v7, %v1327_v48 }
0x1cf1   :  { %2175 = vtanh.f32 %v1337_v15 }
0x1cfe   :  { %v2176_v41 = vpop.eup %2175 }
0x1cff   :  { %1340 = vrot.lane.b32.xlu1 %v2176_v41, %s2297_s29 }
0x1d03   :  { %2054 = vrot.lane.b32.xlu1 %v2053_v16, %s2305_s25 }
0x1d71   :  { %v1341_v2 = vpop.permute.xlu1 %1340 }
0x1d72   :  { %v1343_v5 = vmul.f32 %v2174_v12, %v1341_v2 }
0x1d74   :  { %v1345_v20 = vpack.c.bf16 %v1343_v5, %v1343_v5 }
0x1d75   :  { %v2055_v59 = vpop.permute.xlu1 %2054 }
0x1d76   :  { %v2057_v6 = vunpack.i.h.bf16 %v2055_v59  ;;  %v2056_v23 = vunpack.i.l.bf16 %v2055_v59  ;;  %1347 = vrot.lane.b32.xlu0 %v1345_v20, %s2305_s25 }
0x1d78   :  { %v861_v24 = vsel %vm215_vm2, %v2057_v6, 0.0  ;;  %v779_v27 = vsel %vm215_vm2, %v2056_v23, 0.0 }
0x1d79   :  { %v862_v29 = vpack.c.bf16 %v861_v24, %v861_v24  ;;  %v780_v30 = vpack.c.bf16 %v779_v27, %v779_v27 }
0x1d7b   :  { %864 = vst [vmem:[#allocation3 + $0x1c] sm:$0xf] %v862_v29  ;;  %782 = vst [vmem:[#allocation3 + $0x18] sm:$0xf] %v780_v30 }
0x1d82   :  { %v2078_v32 = vld [vmem:[#allocation3 + $0x18] sm:$0xff]  }
0x1d83   :  { %1951 = vmatmul.mubr.bf16.gmra.mxu0 %v2078_v32 }
0x1d84   :  { %1998 = vmatprep.mubr.msk.bf16.mxu0 %vm2303_vm0, %v2302_v0 }
0x1de8   :  { %v1348_v11 = vpop.permute.xlu0 %1347 }
0x1de9   :  { %1991 = vmatmul.mubr.msk.bf16.vlgmr.msra.gmra.mxu1 %vm215_vm2, %v1348_v11 }
0x1dea   :  { %2003 = vmatpush3.bf16.msra.mxu1 %v2541_v17  ;;  %2006 = vmatprep.mubr.msk.bf16.mxu1 %vm2303_vm0, %v2302_v0 }
0x1deb   :  { %2004 = vmatprep.subr.bf16.mxu1 %v2302_v0 }
0x1dee   :  { %2005 = vmatpush3.bf16.msra.mxu1 %v2548_v18 }
0x1def   :  { %2018 = vmatprep.subr.bf16.mxu1 %v2302_v0 }
0x1e43   :  { %v2647_v21 = vpop.f32.mrf.mxu0 }
0x1e45   :  { %v1019_v33 = vpop.f32.mrf.mxu0 }
0x1e46   :  { %v1020_v34 = vadd.f32 %v2572_v25, %v1019_v33 }
0x1e47   :  { %v2660_v53 = vpop.f32.mrf.mxu0 }
0x1e49   :  { %v1022_v51 = vpop.f32.mrf.mxu0 }
0x1e4a   :  { %v1023_v52 = vadd.f32 %v2572_v25, %v1022_v51 }
0x1ea9   :  { %v1386_v35 = vpop.f32.mrf.mxu1 }
0x1eaa   :  { %v1392_v8 = vadd.f32 %v1386_v35, %v1020_v34 }
0x1eab   :  { %v1992_v58 = vpop.f32.mrf.mxu1 }
0x1eac   :  { %2177 = vtanh.f32 %v1392_v8  ;;  %v1777_v38 = vmul.f32 -1.442695, %v1392_v8  ;;  %v1031_v58 = vadd.f32 %v2660_v53, %v2572_v25 }
0x1ead   :  { %v1389_v36 = vpop.f32.mrf.mxu1 }
0x1eae   :  { %2179 = vpow2.f32 %v1777_v38 }
0x1eaf   :  { %v1993_v31 = vpop.f32.mrf.mxu1 }
0x1eb9   :  { %v2178_v37 = vpop.eup %2177 }
0x1eba   :  { %1402 = vrot.lane.b32.xlu1 %v2178_v37, %s2297_s29 }
0x1ebb   :  { %v2180_v39 = vpop.eup %2179 }
0x1ebc   :  { %v1396_v40 = vadd.f32 1.0, %v2180_v39 }
0x1ebe   :  { %2181 = vrcp.f32 %v1396_v40 }
0x1ecb   :  { %v2182_v42 = vpop.eup %2181 }
0x1ecc   :  { %v1400_v44 = vmul.f32 %v2182_v42, %v1337_v15  ;;  %v1028_v15 = vadd.f32 %v2647_v21, %v2572_v25 }
0x1f2c   :  { %v1403_v43 = vpop.permute.xlu1 %1402 }
0x1f2d   :  { %v1405_v56 = vmul.f32 %v2182_v42, %v1403_v43 }
0x1f2f   :  { %1407 = vrot.lane.b32.xlu0 %v1405_v56, %s2305_s25 }
0x1fa1   :  { %v1408_v22 = vpop.permute.xlu0 %1407 }
0x1fa2   :  { %v1410_v45 = vadd.f32 %v1408_v22, %v1400_v44 }
0x1fa4   :  { %2183 = vtanh.f32 %v1410_v45 }
0x1fb1   :  { %v2184_v46 = vpop.eup %2183 }
0x1fb2   :  { %1413 = vrot.lane.b32.xlu1 %v2184_v46, %s2297_s29 }
0x2024   :  { %v1414_v50 = vpop.permute.xlu1 %1413 }
0x2025   :  { %v1416_v47 = vmul.f32 %v2182_v42, %v1414_v50 }
0x2027   :  { %v1418_v49 = vpack.c.bf16 %v1416_v47, %v1416_v47  ;;  %v2079_v47 = vld [vmem:[%s2702_s5 + $0x8] sm:$0xff]  }
0x2029   :  { %1420 = vrot.lane.b32.xlu0 %v1418_v49, %s2305_s25  ;;  %v2080_v49 = vld [vmem:[%s2702_s5] sm:$0xff]   ;;  %s1713_s5 = sshll.u32 %s2306_s2, 4  ;;  %s1714_s5 = int_to_ptr.vmem [resolvable:$true] %s1713_s5 }
0x202a   :  { %p2274_p2 = scmp.lt.s32.totalorder %s1714_s5, %s1714_s5 }
0x209b   :  { %v1421_v28 = vpop.permute.xlu0 %1420 }
0x209c   :  { %1999 = vmatmul.mubr.msk.bf16.vlgmr.msra.gmra.mxu0 %vm215_vm2, %v1421_v28 }
0x209d   :  { %2011 = vmatpush3.bf16.msra.mxu0 %v2541_v17  ;;  %2014 = vmatprep.mubr.msk.bf16.mxu0 %vm2303_vm0, %v2302_v0 }
0x209e   :  { %2012 = vmatprep.subr.bf16.mxu0 %v2302_v0 }
0x20a1   :  { %2013 = vmatpush3.bf16.msra.mxu0 %v2548_v18 }
0x215c   :  { %v1459_v54 = vpop.f32.mrf.mxu0 }
0x215d   :  { %v1465_v55 = vadd.f32 %v1459_v54, %v1023_v52 }
0x215e   :  { %v2000_v60 = vpop.f32.mrf.mxu0 }
0x215f   :  { %2185 = vtanh.f32 %v1465_v55  ;;  %v1779_v17 = vmul.f32 -1.442695, %v1465_v55  ;;  %v1784_v55 = vld [vmem:[%s2703_s6] ss:$0 sm:$0xff] }
0x2160   :  { %v1462_v61 = vpop.f32.mrf.mxu0 }
0x2161   :  { %2187 = vpow2.f32 %v1779_v17 }
0x2162   :  { %v2001_v4 = vpop.f32.mrf.mxu0 }
0x216c   :  { %v2186_v26 = vpop.eup %2185 }
0x216d   :  { %1475 = vrot.lane.b32.xlu1 %v2186_v26, %s2297_s29 }
0x216e   :  { %v2188_v57 = vpop.eup %2187 }
0x216f   :  { %v1469_v62 = vadd.f32 1.0, %v2188_v57 }
0x2171   :  { %2189 = vrcp.f32 %v1469_v62 }
0x217e   :  { %v2190_v18 = vpop.eup %2189 }
0x217f   :  { %v1473_v3 = vmul.f32 %v2190_v18, %v1410_v45 }
0x21df   :  { %v1476_v63 = vpop.permute.xlu1 %1475 }
0x21e0   :  { %v1478_v1 = vmul.f32 %v2190_v18, %v1476_v63 }
0x21e2   :  { %1480 = vrot.lane.b32.xlu0 %v1478_v1, %s2305_s25 }
0x2254   :  { %v1481_v9 = vpop.permute.xlu0 %1480 }
0x2255   :  { %v1483_v10 = vadd.f32 %v1481_v9, %v1473_v3 }
0x2257   :  { %2191 = vtanh.f32 %v1483_v10 }
0x2264   :  { %v2192_v12 = vpop.eup %2191 }
0x2265   :  { %1486 = vrot.lane.b32.xlu1 %v2192_v12, %s2297_s29 }
0x22d7   :  { %v1487_v13 = vpop.permute.xlu1 %1486 }
0x22d8   :  { %v1489_v14 = vmul.f32 %v2190_v18, %v1487_v13 }
0x22da   :  { %v1491_v48 = vpack.c.bf16 %v1489_v14, %v1489_v14 }
0x22dc   :  { %1493 = vrot.lane.b32.xlu0 %v1491_v48, %s2305_s25 }
0x234e   :  { %v1494_v7 = vpop.permute.xlu0 %1493 }
0x234f   :  { %2007 = vmatmul.mubr.msk.bf16.vlgmr.msra.gmra.mxu1 %vm215_vm2, %v1494_v7 }
0x2350   :  { %2022 = vmatprep.mubr.msk.bf16.mxu1 %vm2303_vm0, %v2302_v0  ;;  %2019 = vmatpush3.bf16.msra.mxu1 %v2079_v47 }
0x2351   :  { %2020 = vmatprep.subr.bf16.mxu1 %v2302_v0 }
0x2354   :  { %2021 = vmatpush3.bf16.msra.mxu1 %v2080_v49 }
0x240f   :  { %v1532_v19 = vpop.f32.mrf.mxu1 }
0x2410   :  { %v1538_v41 = vadd.f32 %v1532_v19, %v1028_v15 }
0x2411   :  { %v2008_v16 = vpop.f32.mrf.mxu1 }
0x2412   :  { %2193 = vtanh.f32 %v1538_v41  ;;  %v1781_v59 = vmul.f32 -1.442695, %v1538_v41 }
0x2413   :  { %v1535_v2 = vpop.f32.mrf.mxu1 }
0x2414   :  { %2195 = vpow2.f32 %v1781_v59 }
0x2415   :  { %v2009_v5 = vpop.f32.mrf.mxu1 }
0x241f   :  { %v2194_v20 = vpop.eup %2193 }
0x2420   :  { %1548 = vrot.lane.b32.xlu1 %v2194_v20, %s2297_s29 }
0x2421   :  { %v2196_v6 = vpop.eup %2195 }
0x2422   :  { %v1542_v23 = vadd.f32 1.0, %v2196_v6 }
0x2424   :  { %2197 = vrcp.f32 %v1542_v23 }
0x2431   :  { %v2198_v24 = vpop.eup %2197 }
0x2432   :  { %v1546_v30 = vmul.f32 %v2198_v24, %v1483_v10 }
0x2492   :  { %v1549_v27 = vpop.permute.xlu1 %1548 }
0x2493   :  { %v1551_v29 = vmul.f32 %v2198_v24, %v1549_v27 }
0x2495   :  { %1553 = vrot.lane.b32.xlu0 %v1551_v29, %s2305_s25 }
0x2507   :  { %v1554_v32 = vpop.permute.xlu0 %1553 }
0x2508   :  { %v1556_v11 = vadd.f32 %v1554_v32, %v1546_v30 }
0x250a   :  { %2199 = vtanh.f32 %v1556_v11 }
0x2517   :  { %v2200_v21 = vpop.eup %2199 }
0x2518   :  { %1559 = vrot.lane.b32.xlu1 %v2200_v21, %s2297_s29 }
0x258a   :  { %v1560_v33 = vpop.permute.xlu1 %1559 }
0x258b   :  { %v1562_v34 = vmul.f32 %v2198_v24, %v1560_v33 }
0x258d   :  { %v1564_v35 = vpack.c.bf16 %v1562_v34, %v1562_v34 }
0x258f   :  { %1566 = vrot.lane.b32.xlu0 %v1564_v35, %s2305_s25 }
0x2601   :  { %v1567_v8 = vpop.permute.xlu0 %1566 }
0x2602   :  { %2015 = vmatmul.mubr.msk.bf16.vlgmr.msra.gmra.mxu0 %vm215_vm2, %v1567_v8 }
0x26c2   :  { %v1605_v36 = vpop.f32.mrf.mxu0 }
0x26c3   :  { %v1611_v31 = vadd.f32 %v1605_v36, %v1031_v58 }
0x26c4   :  { %v2016_v37 = vpop.f32.mrf.mxu0 }
0x26c5   :  { %2201 = vtanh.f32 %v1611_v31  ;;  %v1783_v42 = vmul.f32 -1.442695, %v1611_v31 }
0x26c6   :  { %v1608_v38 = vpop.f32.mrf.mxu0 }
0x26c7   :  { %2203 = vpow2.f32 %v1783_v42 }
0x26c8   :  { %v2017_v39 = vpop.f32.mrf.mxu0 }
0x26d2   :  { %v2202_v40 = vpop.eup %2201 }
0x26d3   :  { %1621 = vrot.lane.b32.xlu1 %v2202_v40, %s2297_s29 }
0x26d4   :  { %v2204_v43 = vpop.eup %2203 }
0x26d5   :  { %v1615_v56 = vadd.f32 1.0, %v2204_v43 }
0x26d7   :  { %2205 = vrcp.f32 %v1615_v56 }
0x26e4   :  { %v2206_v44 = vpop.eup %2205 }
0x26e5   :  { %v1619_v25 = vmul.f32 %v2206_v44, %v1556_v11 }
0x2745   :  { %v1622_v22 = vpop.permute.xlu1 %1621 }
0x2746   :  { %v1624_v45 = vmul.f32 %v2206_v44, %v1622_v22 }
0x2748   :  { %1626 = vrot.lane.b32.xlu0 %v1624_v45, %s2305_s25 }
0x27ba   :  { %v1627_v46 = vpop.permute.xlu0 %1626 }
0x27bb   :  { %v1629_v50 = vadd.f32 %v1627_v46, %v1619_v25 }
0x27bd   :  { %2207 = vtanh.f32 %v1629_v50 }
0x27ca   :  { %v2208_v28 = vpop.eup %2207 }
0x27cb   :  { %1632 = vrot.lane.b32.xlu1 %v2208_v28, %s2297_s29  ;;  %s2269_s29 = scalar_lea.vmem %s1714_s5, 128 }
0x27cc   :  { %p2270_p1 = scmp.ne.s32.totalorder %s1714_s5, %s2269_s29  ;;  %p2275_p3 = scmp.lt.s32.totalorder %s2269_s29, %s2269_s29 }
0x27ce   :  { %p2276_p4 = por %p2275_p3, %p2274_p2 }
0x27d0   :  { %p2277_p5 = pnand %p2276_p4, %p2270_p1 }
0x283d   :  { %v1633_v53 = vpop.permute.xlu1 %1632 }
0x283e   :  { %v1635_v51 = vmul.f32 %v2206_v44, %v1633_v53 }
0x2840   :  { %v1636_v52 = vpack.c.bf16 %v1635_v51, %v1635_v51 }
0x2842   :  { %1649 = vrot.lane.b32.xlu0 %v1636_v52, %s2305_s25 }
0x28b4   :  { %v1650_v54 = vpop.permute.xlu0 %1649 }
0x28b5   :  { %2023 = vmatmul.mubr.msk.bf16.vlgmr.msra.gmra.mxu1 %vm215_vm2, %v1650_v54 }
0x2975   :  { %v1700_v60 = vpop.f32.mrf.mxu1 }
0x2976   :  { %v1701_v0 = vadd.f32 %v1784_v55, %v1700_v60 }
0x2977   :  { %v2024_v61 = vpop.f32.mrf.mxu1 }
0x2978   :  { %1706 = vst [vmem:[#allocation10] sm:$0xff] %v1701_v0 }
0x2979   :  { %v1703_v4 = vpop.f32.mrf.mxu1 }
0x297a   :  { %2280 = shalt.err (!%p2277_p5)
}
0x297b   :  { %1716 = dma.vmem_to_hbm [thread:$0]  %s1714_s5, 128, %s2704_s7, [#allocation6]   ;;  %v2025_v26 = vpop.f32.mrf.mxu1 }
0x297c   :  { %2293 = dma.done.wait [#allocation6], 128  }
0x297d   :  { %2294 = vsyncadd [#allocation6], 4294967168 }
0x297e   :  { %1720 = vsyncpa [#allocation5], 1 }
0x297f   :  { %1721 = vsyncpa [#allocation8], 1 }
0x2980   :  { %1722 = vsyncpa [#allocation6], 1 }

</bundles_post_ra>
